<compile_context>
chip_gen: v6e
topology: v6e:2x2x1
jax: 0.10.0
libtpu: 0.0.40
codegen_flags: <defaults>
</compile_context>

<pallas_src>
import jax
import jax.numpy as jnp
from jax import lax
from jax.experimental import pallas as pl
from jax.experimental.pallas import tpu as pltpu

BN_EPS = 1e-5


def _make_double_conv_kernel(N, Cin, Cout, H, W):
    Cpad = max(Cin, Cout)            # channel rows padded so im2col stores are sublane-aligned
    HW = H * W
    PAD = W + 1                      # zero halo per side of each batch's flattened spatial axis
    HWP = HW + 2 * PAD
    inv_count = 1.0 / float(N * HW)  # BN normalization (biased variance)

    def kernel(x_ref, w1_ref, g1_ref, b1_ref, w2_ref, g2_ref, b2_ref, o_ref,
               xp_ref, col_ref):
        # Column-index masks for the W boundary (the H boundary is handled by the zero halo,
        # since each row of xp_ref is one channel plane of the flattened per-batch spatial axis).
        w_idx = lax.broadcasted_iota(jnp.int32, (1, HW), 1) % W
        not_first_col = w_idx >= 1          # valid when the tap reads column w-1
        not_last_col = w_idx <= (W - 2)     # valid when the tap reads column w+1

        def build_im2col():
            # Stack the 9 masked tap windows into col_ref: (9*Cpad, N*HW).
            for n in range(N):
                base = n * HWP + PAD
                for dy in range(3):
                    for dx in range(3):
                        t = dy * 3 + dx
                        k = (dy - 1) * W + (dx - 1)
                        xs = xp_ref[:, base + k: base + k + HW]        # (Cpad, HW) lane window
                        if dx == 0:
                            xs = jnp.where(not_first_col, xs, 0.0)
                        elif dx == 2:
                            xs = jnp.where(not_last_col, xs, 0.0)
                        col_ref[t * Cpad:(t + 1) * Cpad, n * HW:(n + 1) * HW] = xs

        def bn_relu(h, g_ref, b_ref):
            # h: (Cout, N*HW). One-pass batch stats over (N, H, W); var = E[x^2] - E[x]^2.
            s = jnp.sum(h, axis=1, keepdims=True)                      # (Cout, 1)
            ss = jnp.sum(h * h, axis=1, keepdims=True)
            mean = s * inv_count
            var = ss * inv_count - mean * mean                         # biased variance
            scale = g_ref[...] * lax.rsqrt(var + BN_EPS)               # (Cout, 1)
            shift = b_ref[...] - mean * scale
            # BN affine + ReLU (act = nn.ReLU for this instance).
            return jnp.maximum(h * scale + shift, 0.0)

        # Zero the padded plane scratch once: halo columns stay zero for both convs; channel
        # rows >= Cin stay zero for conv1; any stale rows in conv2 only meet zero weight columns.
        xp_ref[...] = jnp.zeros(xp_ref.shape, xp_ref.dtype)

        # ---- conv1: stage input planes, im2col, one MXU matmul, BN + ReLU ----
        for n in range(N):
            xp_ref[0:Cin, n * HWP + PAD: n * HWP + PAD + HW] = (
                x_ref[n * Cin:(n + 1) * Cin, :].astype(jnp.float32))
        build_im2col()
        h1 = jnp.dot(w1_ref[...], col_ref[...],
                     preferred_element_type=jnp.float32)               # (Cout, N*HW)
        h1 = bn_relu(h1, g1_ref, b1_ref)

        # ---- conv2: restage h1 into the same padded scratch, repeat ----
        for n in range(N):
            xp_ref[0:Cout, n * HWP + PAD: n * HWP + PAD + HW] = h1[:, n * HW:(n + 1) * HW]
        build_im2col()
        h2 = jnp.dot(w2_ref[...], col_ref[...],
                     preferred_element_type=jnp.float32)               # (Cout, N*HW)
        h2 = bn_relu(h2, g2_ref, b2_ref)

        # Lane-dense output store: (N*Cout, HW) with HW = 256 lanes -> unmasked full-width vst.
        for n in range(N):
            o_ref[n * Cout:(n + 1) * Cout, :] = h2[:, n * HW:(n + 1) * HW].astype(o_ref.dtype)

    return kernel


def u_double_conv(x_nchw, w1, g1, b1, w2, g2, b2):
    """x_nchw: (N, Cin, H, W); w1: (Cout, Cin, 3, 3); w2: (Cout, Cout, 3, 3);
    g*/b*: (Cout,). Returns (N, Cout, H, W)."""
    N, Cin, H, W = x_nchw.shape
    Cout = w1.shape[0]
    Cpad = max(Cin, Cout)
    HW = H * W
    HWP = HW + 2 * (W + 1)

    # Pure reshape (no HBM transpose pass): spatial stays minor, batch*channels go to sublanes.
    x2d = x_nchw.reshape(N * Cin, HW)

    def pack_w(w):
        # (O, I, 3, 3) -> (O, 9*Cpad), index [o, (dy*3+dx)*Cpad + c] = w[o, c, dy, dx];
        # channel columns c >= I are zero so the padded contraction dim is inert.
        O, I = w.shape[0], w.shape[1]
        wt = jnp.transpose(w, (0, 2, 3, 1))                       # (O, 3, 3, I)
        wt = jnp.pad(wt, ((0, 0), (0, 0), (0, 0), (0, Cpad - I)))
        return wt.reshape(O, 9 * Cpad).astype(jnp.float32)

    vmem = pl.BlockSpec(memory_space=pltpu.MemorySpace.VMEM)
    kernel = _make_double_conv_kernel(N, Cin, Cout, H, W)

    out2d = pl.pallas_call(
        kernel,
        out_shape=jax.ShapeDtypeStruct((N * Cout, HW), x_nchw.dtype),
        in_specs=[vmem] * 7,
        out_specs=vmem,
        scratch_shapes=[
            pltpu.VMEM((Cpad, N * HWP), jnp.float32),      # zero-padded channel planes (reused)
            pltpu.VMEM((9 * Cpad, N * HW), jnp.float32),   # im2col patch matrix (reused)
        ],
    )(
        x2d, pack_w(w1),
        g1.reshape(Cout, 1).astype(jnp.float32), b1.reshape(Cout, 1).astype(jnp.float32),
        pack_w(w2),
        g2.reshape(Cout, 1).astype(jnp.float32), b2.reshape(Cout, 1).astype(jnp.float32),
    )
    return out2d.reshape(N, Cout, H, W)   # pure reshape back to NCHW


def _reference(x_nchw, w1, g1, b1, w2, g2, b2):
    """Pure-JAX reference (training-mode BN, biased variance, ReLU)."""
    def conv(x, w):
        return lax.conv_general_dilated(
            x, w, window_strides=(1, 1), padding=((1, 1), (1, 1)),
            dimension_numbers=("NCHW", "OIHW", "NCHW"))

    def bn_relu(h, g, b):
        mean = jnp.mean(h, axis=(0, 2, 3), keepdims=True)
        var = jnp.mean((h - mean) ** 2, axis=(0, 2, 3), keepdims=True)
        hn = (h - mean) / jnp.sqrt(var + BN_EPS)
        hn = hn * g.reshape(1, -1, 1, 1) + b.reshape(1, -1, 1, 1)
        return jnp.maximum(hn, 0.0)

    h = bn_relu(conv(x_nchw, w1), g1, b1)
    return bn_relu(conv(h, w2), g2, b2)


if __name__ == "__main__":
    N, in_ch, out_ch, H, W = 2, 4, 8, 16, 16

    key = jax.random.PRNGKey(0)
    kx, kw1, kw2 = jax.random.split(key, 3)

    x = jax.random.normal(kx, (N, in_ch, H, W), dtype=jnp.float32)
    # Conv2d weights (PyTorch layout: out_ch, in_ch, kH, kW), deterministic init.
    w1 = 0.1 * jax.random.normal(kw1, (out_ch, in_ch, 3, 3), dtype=jnp.float32)
    w2 = 0.1 * jax.random.normal(kw2, (out_ch, out_ch, 3, 3), dtype=jnp.float32)
    # BatchNorm2d default init: gamma=1, beta=0.
    g1 = jnp.ones((out_ch,), jnp.float32)
    b1 = jnp.zeros((out_ch,), jnp.float32)
    g2 = jnp.ones((out_ch,), jnp.float32)
    b2 = jnp.zeros((out_ch,), jnp.float32)

    out = u_double_conv(x, w1, g1, b1, w2, g2, b2)
    out = jax.block_until_ready(out)

    ref = _reference(x, w1, g1, b1, w2, g2, b2)
    assert out.shape == (N, out_ch, H, W), out.shape
    assert jnp.allclose(out, ref, atol=1e-3, rtol=1e-3), float(jnp.max(jnp.abs(out - ref)))

    print("KERNEL_OK")
</pallas_src>

<mosaic_0001>
module attributes {stable_mosaic.version = 11 : i64} {
  func.func @kernel(%arg0: memref<8x256xf32, #tpu.memory_space<vmem>>, %arg1: memref<8x72xf32, #tpu.memory_space<vmem>>, %arg2: memref<8x1xf32, #tpu.memory_space<vmem>>, %arg3: memref<8x1xf32, #tpu.memory_space<vmem>>, %arg4: memref<8x72xf32, #tpu.memory_space<vmem>>, %arg5: memref<8x1xf32, #tpu.memory_space<vmem>>, %arg6: memref<8x1xf32, #tpu.memory_space<vmem>>, %arg7: memref<16x256xf32, #tpu.memory_space<vmem>>, %arg8: memref<8x580xf32, #tpu.memory_space<vmem>>, %arg9: memref<72x512xf32, #tpu.memory_space<vmem>>) attributes {dimension_semantics = [], scalar_prefetch = 0 : i64, scratch_operands = 2 : i64, tpu.core_type = #tpu.core_type<tc>} {
    %0 = tpu.iota {dimensions = array<i32: 1>} : vector<1x256xi32>
    %c16_i32 = arith.constant 16 : i32
    %c0_i32 = arith.constant 0 : i32
    %1 = arith.cmpi eq, %c16_i32, %c0_i32 : i32
    %c1_i32 = arith.constant 1 : i32
    %2 = arith.select %1, %c1_i32, %c16_i32 : i32
    %3 = vector.broadcast %2 : i32 to vector<1x256xi32>
    %4 = arith.remsi %0, %3 : vector<1x256xi32>
    %c0_i32_0 = arith.constant 0 : i32
    %5 = vector.broadcast %c0_i32_0 : i32 to vector<1x256xi32>
    %6 = arith.cmpi ne, %4, %5 : vector<1x256xi32>
    %c0_i32_1 = arith.constant 0 : i32
    %7 = vector.broadcast %c0_i32_1 : i32 to vector<1x256xi32>
    %8 = arith.cmpi slt, %4, %7 : vector<1x256xi32>
    %c0_i32_2 = arith.constant 0 : i32
    %9 = arith.cmpi slt, %2, %c0_i32_2 : i32
    %10 = vector.broadcast %9 : i1 to vector<1x256xi1>
    %11 = vector.broadcast %10 : vector<1x256xi1> to vector<1x256xi1>
    %12 = arith.xori %8, %11 : vector<1x256xi1>
    %13 = arith.andi %12, %6 : vector<1x256xi1>
    %14 = vector.broadcast %2 : i32 to vector<1x256xi32>
    %15 = arith.addi %4, %14 : vector<1x256xi32>
    %16 = arith.select %13, %15, %4 : vector<1x256xi1>, vector<1x256xi32>
    %c1_i32_3 = arith.constant 1 : i32
    %17 = vector.broadcast %c1_i32_3 : i32 to vector<1x256xi32>
    %18 = arith.cmpi sge, %16, %17 : vector<1x256xi32>
    %c14_i32 = arith.constant 14 : i32
    %19 = vector.broadcast %c14_i32 : i32 to vector<1x256xi32>
    %20 = arith.cmpi sle, %16, %19 : vector<1x256xi32>
    %cst = arith.constant 0.000000e+00 : f32
    %21 = vector.broadcast %cst : f32 to vector<8x580xf32>
    %c0 = arith.constant 0 : index
    %c0_4 = arith.constant 0 : index
    %22 = vector.load %arg8[%c0, %c0_4] : memref<8x580xf32, #tpu.memory_space<vmem>>, vector<8x580xf32>
    tpu.vector_store %arg8[%c0, %c0_4], %21 {strides = array<i32>} : memref<8x580xf32, #tpu.memory_space<vmem>>, vector<8x580xf32>,
    %c0_5 = arith.constant 0 : index
    %c0_6 = arith.constant 0 : index
    %23 = vector.load %arg0[%c0_5, %c0_6] : memref<8x256xf32, #tpu.memory_space<vmem>>, vector<4x256xf32>
    %c0_7 = arith.constant 0 : index
    %c17 = arith.constant 17 : index
    %24 = vector.load %arg8[%c0_7, %c17] : memref<8x580xf32, #tpu.memory_space<vmem>>, vector<4x256xf32>
    tpu.vector_store %arg8[%c0_7, %c17], %23 {strides = array<i32>} : memref<8x580xf32, #tpu.memory_space<vmem>>, vector<4x256xf32>,
    %c4 = arith.constant 4 : index
    %c0_8 = arith.constant 0 : index
    %25 = vector.load %arg0[%c4, %c0_8] : memref<8x256xf32, #tpu.memory_space<vmem>>, vector<4x256xf32>
    %c0_9 = arith.constant 0 : index
    %c307 = arith.constant 307 : index
    %26 = vector.load %arg8[%c0_9, %c307] : memref<8x580xf32, #tpu.memory_space<vmem>>, vector<4x256xf32>
    tpu.vector_store %arg8[%c0_9, %c307], %25 {strides = array<i32>} : memref<8x580xf32, #tpu.memory_space<vmem>>, vector<4x256xf32>,
    %c0_10 = arith.constant 0 : index
    %c0_11 = arith.constant 0 : index
    %27 = vector.load %arg8[%c0_10, %c0_11] : memref<8x580xf32, #tpu.memory_space<vmem>>, vector<8x256xf32>
    %cst_12 = arith.constant 0.000000e+00 : f32
    %28 = vector.shape_cast %18 : vector<1x256xi1> to vector<1x256xi1>
    %29 = vector.broadcast %28 : vector<1x256xi1> to vector<8x256xi1>
    %30 = vector.broadcast %cst_12 : f32 to vector<8x256xf32>
    %31 = arith.select %29, %27, %30 : vector<8x256xi1>, vector<8x256xf32>
    %c0_13 = arith.constant 0 : index
    %c0_14 = arith.constant 0 : index
    %32 = vector.load %arg9[%c0_13, %c0_14] : memref<72x512xf32, #tpu.memory_space<vmem>>, vector<8x256xf32>
    tpu.vector_store %arg9[%c0_13, %c0_14], %31 {strides = array<i32>} : memref<72x512xf32, #tpu.memory_space<vmem>>, vector<8x256xf32>,
    %c0_15 = arith.constant 0 : index
    %c1 = arith.constant 1 : index
    %33 = vector.load %arg8[%c0_15, %c1] : memref<8x580xf32, #tpu.memory_space<vmem>>, vector<8x256xf32>
    %c8 = arith.constant 8 : index
    %c0_16 = arith.constant 0 : index
    %34 = vector.load %arg9[%c8, %c0_16] : memref<72x512xf32, #tpu.memory_space<vmem>>, vector<8x256xf32>
    tpu.vector_store %arg9[%c8, %c0_16], %33 {strides = array<i32>} : memref<72x512xf32, #tpu.memory_space<vmem>>, vector<8x256xf32>,
    %c0_17 = arith.constant 0 : index
    %c2 = arith.constant 2 : index
    %35 = vector.load %arg8[%c0_17, %c2] : memref<8x580xf32, #tpu.memory_space<vmem>>, vector<8x256xf32>
    %cst_18 = arith.constant 0.000000e+00 : f32
    %36 = vector.shape_cast %20 : vector<1x256xi1> to vector<1x256xi1>
    %37 = vector.broadcast %36 : vector<1x256xi1> to vector<8x256xi1>
    %38 = vector.broadcast %cst_18 : f32 to vector<8x256xf32>
    %39 = arith.select %37, %35, %38 : vector<8x256xi1>, vector<8x256xf32>
    %c16 = arith.constant 16 : index
    %c0_19 = arith.constant 0 : index
    %40 = vector.load %arg9[%c16, %c0_19] : memref<72x512xf32, #tpu.memory_space<vmem>>, vector<8x256xf32>
    tpu.vector_store %arg9[%c16, %c0_19], %39 {strides = array<i32>} : memref<72x512xf32, #tpu.memory_space<vmem>>, vector<8x256xf32>,
    %c0_20 = arith.constant 0 : index
    %c16_21 = arith.constant 16 : index
    %41 = vector.load %arg8[%c0_20, %c16_21] : memref<8x580xf32, #tpu.memory_space<vmem>>, vector<8x256xf32>
    %cst_22 = arith.constant 0.000000e+00 : f32
    %42 = vector.shape_cast %18 : vector<1x256xi1> to vector<1x256xi1>
    %43 = vector.broadcast %42 : vector<1x256xi1> to vector<8x256xi1>
    %44 = vector.broadcast %cst_22 : f32 to vector<8x256xf32>
    %45 = arith.select %43, %41, %44 : vector<8x256xi1>, vector<8x256xf32>
    %c24 = arith.constant 24 : index
    %c0_23 = arith.constant 0 : index
    %46 = vector.load %arg9[%c24, %c0_23] : memref<72x512xf32, #tpu.memory_space<vmem>>, vector<8x256xf32>
    tpu.vector_store %arg9[%c24, %c0_23], %45 {strides = array<i32>} : memref<72x512xf32, #tpu.memory_space<vmem>>, vector<8x256xf32>,
    %c0_24 = arith.constant 0 : index
    %c17_25 = arith.constant 17 : index
    %47 = vector.load %arg8[%c0_24, %c17_25] : memref<8x580xf32, #tpu.memory_space<vmem>>, vector<8x256xf32>
    %c32 = arith.constant 32 : index
    %c0_26 = arith.constant 0 : index
    %48 = vector.load %arg9[%c32, %c0_26] : memref<72x512xf32, #tpu.memory_space<vmem>>, vector<8x256xf32>
    tpu.vector_store %arg9[%c32, %c0_26], %47 {strides = array<i32>} : memref<72x512xf32, #tpu.memory_space<vmem>>, vector<8x256xf32>,
    %c0_27 = arith.constant 0 : index
    %c18 = arith.constant 18 : index
    %49 = vector.load %arg8[%c0_27, %c18] : memref<8x580xf32, #tpu.memory_space<vmem>>, vector<8x256xf32>
    %cst_28 = arith.constant 0.000000e+00 : f32
    %50 = vector.shape_cast %20 : vector<1x256xi1> to vector<1x256xi1>
    %51 = vector.broadcast %50 : vector<1x256xi1> to vector<8x256xi1>
    %52 = vector.broadcast %cst_28 : f32 to vector<8x256xf32>
    %53 = arith.select %51, %49, %52 : vector<8x256xi1>, vector<8x256xf32>
    %c40 = arith.constant 40 : index
    %c0_29 = arith.constant 0 : index
    %54 = vector.load %arg9[%c40, %c0_29] : memref<72x512xf32, #tpu.memory_space<vmem>>, vector<8x256xf32>
    tpu.vector_store %arg9[%c40, %c0_29], %53 {strides = array<i32>} : memref<72x512xf32, #tpu.memory_space<vmem>>, vector<8x256xf32>,
    %c0_30 = arith.constant 0 : index
    %c32_31 = arith.constant 32 : index
    %55 = vector.load %arg8[%c0_30, %c32_31] : memref<8x580xf32, #tpu.memory_space<vmem>>, vector<8x256xf32>
    %cst_32 = arith.constant 0.000000e+00 : f32
    %56 = vector.shape_cast %18 : vector<1x256xi1> to vector<1x256xi1>
    %57 = vector.broadcast %56 : vector<1x256xi1> to vector<8x256xi1>
    %58 = vector.broadcast %cst_32 : f32 to vector<8x256xf32>
    %59 = arith.select %57, %55, %58 : vector<8x256xi1>, vector<8x256xf32>
    %c48 = arith.constant 48 : index
    %c0_33 = arith.constant 0 : index
    %60 = vector.load %arg9[%c48, %c0_33] : memref<72x512xf32, #tpu.memory_space<vmem>>, vector<8x256xf32>
    tpu.vector_store %arg9[%c48, %c0_33], %59 {strides = array<i32>} : memref<72x512xf32, #tpu.memory_space<vmem>>, vector<8x256xf32>,
    %c0_34 = arith.constant 0 : index
    %c33 = arith.constant 33 : index
    %61 = vector.load %arg8[%c0_34, %c33] : memref<8x580xf32, #tpu.memory_space<vmem>>, vector<8x256xf32>
    %c56 = arith.constant 56 : index
    %c0_35 = arith.constant 0 : index
    %62 = vector.load %arg9[%c56, %c0_35] : memref<72x512xf32, #tpu.memory_space<vmem>>, vector<8x256xf32>
    tpu.vector_store %arg9[%c56, %c0_35], %61 {strides = array<i32>} : memref<72x512xf32, #tpu.memory_space<vmem>>, vector<8x256xf32>,
    %c0_36 = arith.constant 0 : index
    %c34 = arith.constant 34 : index
    %63 = vector.load %arg8[%c0_36, %c34] : memref<8x580xf32, #tpu.memory_space<vmem>>, vector<8x256xf32>
    %cst_37 = arith.constant 0.000000e+00 : f32
    %64 = vector.shape_cast %20 : vector<1x256xi1> to vector<1x256xi1>
    %65 = vector.broadcast %64 : vector<1x256xi1> to vector<8x256xi1>
    %66 = vector.broadcast %cst_37 : f32 to vector<8x256xf32>
    %67 = arith.select %65, %63, %66 : vector<8x256xi1>, vector<8x256xf32>
    %c64 = arith.constant 64 : index
    %c0_38 = arith.constant 0 : index
    %68 = vector.load %arg9[%c64, %c0_38] : memref<72x512xf32, #tpu.memory_space<vmem>>, vector<8x256xf32>
    tpu.vector_store %arg9[%c64, %c0_38], %67 {strides = array<i32>} : memref<72x512xf32, #tpu.memory_space<vmem>>, vector<8x256xf32>,
    %c0_39 = arith.constant 0 : index
    %c290 = arith.constant 290 : index
    %69 = vector.load %arg8[%c0_39, %c290] : memref<8x580xf32, #tpu.memory_space<vmem>>, vector<8x256xf32>
    %cst_40 = arith.constant 0.000000e+00 : f32
    %70 = vector.shape_cast %18 : vector<1x256xi1> to vector<1x256xi1>
    %71 = vector.broadcast %70 : vector<1x256xi1> to vector<8x256xi1>
    %72 = vector.broadcast %cst_40 : f32 to vector<8x256xf32>
    %73 = arith.select %71, %69, %72 : vector<8x256xi1>, vector<8x256xf32>
    %c0_41 = arith.constant 0 : index
    %c256 = arith.constant 256 : index
    %74 = vector.load %arg9[%c0_41, %c256] : memref<72x512xf32, #tpu.memory_space<vmem>>, vector<8x256xf32>
    tpu.vector_store %arg9[%c0_41, %c256], %73 {strides = array<i32>} : memref<72x512xf32, #tpu.memory_space<vmem>>, vector<8x256xf32>,
    %c0_42 = arith.constant 0 : index
    %c291 = arith.constant 291 : index
    %75 = vector.load %arg8[%c0_42, %c291] : memref<8x580xf32, #tpu.memory_space<vmem>>, vector<8x256xf32>
    %c8_43 = arith.constant 8 : index
    %c256_44 = arith.constant 256 : index
    %76 = vector.load %arg9[%c8_43, %c256_44] : memref<72x512xf32, #tpu.memory_space<vmem>>, vector<8x256xf32>
    tpu.vector_store %arg9[%c8_43, %c256_44], %75 {strides = array<i32>} : memref<72x512xf32, #tpu.memory_space<vmem>>, vector<8x256xf32>,
    %c0_45 = arith.constant 0 : index
    %c292 = arith.constant 292 : index
    %77 = vector.load %arg8[%c0_45, %c292] : memref<8x580xf32, #tpu.memory_space<vmem>>, vector<8x256xf32>
    %cst_46 = arith.constant 0.000000e+00 : f32
    %78 = vector.shape_cast %20 : vector<1x256xi1> to vector<1x256xi1>
    %79 = vector.broadcast %78 : vector<1x256xi1> to vector<8x256xi1>
    %80 = vector.broadcast %cst_46 : f32 to vector<8x256xf32>
    %81 = arith.select %79, %77, %80 : vector<8x256xi1>, vector<8x256xf32>
    %c16_47 = arith.constant 16 : index
    %c256_48 = arith.constant 256 : index
    %82 = vector.load %arg9[%c16_47, %c256_48] : memref<72x512xf32, #tpu.memory_space<vmem>>, vector<8x256xf32>
    tpu.vector_store %arg9[%c16_47, %c256_48], %81 {strides = array<i32>} : memref<72x512xf32, #tpu.memory_space<vmem>>, vector<8x256xf32>,
    %c0_49 = arith.constant 0 : index
    %c306 = arith.constant 306 : index
    %83 = vector.load %arg8[%c0_49, %c306] : memref<8x580xf32, #tpu.memory_space<vmem>>, vector<8x256xf32>
    %cst_50 = arith.constant 0.000000e+00 : f32
    %84 = vector.shape_cast %18 : vector<1x256xi1> to vector<1x256xi1>
    %85 = vector.broadcast %84 : vector<1x256xi1> to vector<8x256xi1>
    %86 = vector.broadcast %cst_50 : f32 to vector<8x256xf32>
    %87 = arith.select %85, %83, %86 : vector<8x256xi1>, vector<8x256xf32>
    %c24_51 = arith.constant 24 : index
    %c256_52 = arith.constant 256 : index
    %88 = vector.load %arg9[%c24_51, %c256_52] : memref<72x512xf32, #tpu.memory_space<vmem>>, vector<8x256xf32>
    tpu.vector_store %arg9[%c24_51, %c256_52], %87 {strides = array<i32>} : memref<72x512xf32, #tpu.memory_space<vmem>>, vector<8x256xf32>,
    %c0_53 = arith.constant 0 : index
    %c307_54 = arith.constant 307 : index
    %89 = vector.load %arg8[%c0_53, %c307_54] : memref<8x580xf32, #tpu.memory_space<vmem>>, vector<8x256xf32>
    %c32_55 = arith.constant 32 : index
    %c256_56 = arith.constant 256 : index
    %90 = vector.load %arg9[%c32_55, %c256_56] : memref<72x512xf32, #tpu.memory_space<vmem>>, vector<8x256xf32>
    tpu.vector_store %arg9[%c32_55, %c256_56], %89 {strides = array<i32>} : memref<72x512xf32, #tpu.memory_space<vmem>>, vector<8x256xf32>,
    %c0_57 = arith.constant 0 : index
    %c308 = arith.constant 308 : index
    %91 = vector.load %arg8[%c0_57, %c308] : memref<8x580xf32, #tpu.memory_space<vmem>>, vector<8x256xf32>
    %cst_58 = arith.constant 0.000000e+00 : f32
    %92 = vector.shape_cast %20 : vector<1x256xi1> to vector<1x256xi1>
    %93 = vector.broadcast %92 : vector<1x256xi1> to vector<8x256xi1>
    %94 = vector.broadcast %cst_58 : f32 to vector<8x256xf32>
    %95 = arith.select %93, %91, %94 : vector<8x256xi1>, vector<8x256xf32>
    %c40_59 = arith.constant 40 : index
    %c256_60 = arith.constant 256 : index
    %96 = vector.load %arg9[%c40_59, %c256_60] : memref<72x512xf32, #tpu.memory_space<vmem>>, vector<8x256xf32>
    tpu.vector_store %arg9[%c40_59, %c256_60], %95 {strides = array<i32>} : memref<72x512xf32, #tpu.memory_space<vmem>>, vector<8x256xf32>,
    %c0_61 = arith.constant 0 : index
    %c322 = arith.constant 322 : index
    %97 = vector.load %arg8[%c0_61, %c322] : memref<8x580xf32, #tpu.memory_space<vmem>>, vector<8x256xf32>
    %cst_62 = arith.constant 0.000000e+00 : f32
    %98 = vector.shape_cast %18 : vector<1x256xi1> to vector<1x256xi1>
    %99 = vector.broadcast %98 : vector<1x256xi1> to vector<8x256xi1>
    %100 = vector.broadcast %cst_62 : f32 to vector<8x256xf32>
    %101 = arith.select %99, %97, %100 : vector<8x256xi1>, vector<8x256xf32>
    %c48_63 = arith.constant 48 : index
    %c256_64 = arith.constant 256 : index
    %102 = vector.load %arg9[%c48_63, %c256_64] : memref<72x512xf32, #tpu.memory_space<vmem>>, vector<8x256xf32>
    tpu.vector_store %arg9[%c48_63, %c256_64], %101 {strides = array<i32>} : memref<72x512xf32, #tpu.memory_space<vmem>>, vector<8x256xf32>,
    %c0_65 = arith.constant 0 : index
    %c323 = arith.constant 323 : index
    %103 = vector.load %arg8[%c0_65, %c323] : memref<8x580xf32, #tpu.memory_space<vmem>>, vector<8x256xf32>
    %c56_66 = arith.constant 56 : index
    %c256_67 = arith.constant 256 : index
    %104 = vector.load %arg9[%c56_66, %c256_67] : memref<72x512xf32, #tpu.memory_space<vmem>>, vector<8x256xf32>
    tpu.vector_store %arg9[%c56_66, %c256_67], %103 {strides = array<i32>} : memref<72x512xf32, #tpu.memory_space<vmem>>, vector<8x256xf32>,
    %c0_68 = arith.constant 0 : index
    %c324 = arith.constant 324 : index
    %105 = vector.load %arg8[%c0_68, %c324] : memref<8x580xf32, #tpu.memory_space<vmem>>, vector<8x256xf32>
    %cst_69 = arith.constant 0.000000e+00 : f32
    %106 = vector.shape_cast %20 : vector<1x256xi1> to vector<1x256xi1>
    %107 = vector.broadcast %106 : vector<1x256xi1> to vector<8x256xi1>
    %108 = vector.broadcast %cst_69 : f32 to vector<8x256xf32>
    %109 = arith.select %107, %105, %108 : vector<8x256xi1>, vector<8x256xf32>
    %c64_70 = arith.constant 64 : index
    %c256_71 = arith.constant 256 : index
    %110 = vector.load %arg9[%c64_70, %c256_71] : memref<72x512xf32, #tpu.memory_space<vmem>>, vector<8x256xf32>
    tpu.vector_store %arg9[%c64_70, %c256_71], %109 {strides = array<i32>} : memref<72x512xf32, #tpu.memory_space<vmem>>, vector<8x256xf32>,
    %c0_72 = arith.constant 0 : index
    %c0_73 = arith.constant 0 : index
    %111 = vector.load %arg1[%c0_72, %c0_73] : memref<8x72xf32, #tpu.memory_space<vmem>>, vector<8x72xf32>
    %c0_74 = arith.constant 0 : index
    %c0_75 = arith.constant 0 : index
    %112 = vector.load %arg9[%c0_74, %c0_75] : memref<72x512xf32, #tpu.memory_space<vmem>>, vector<72x512xf32>
    %cst_76 = arith.constant dense<0.000000e+00> : vector<8x512xf32>
    %113 = tpu.matmul %111, %112, %cst_76 {dimension_numbers = #tpu.dot_dimension_numbers<[1], [0], [0], [1], [0, 0, 1, 1], [], []>} : vector<8x72xf32>, vector<72x512xf32>, vector<8x512xf32> -> vector<8x512xf32>
    %cst_77 = arith.constant dense<0.000000e+00> : vector<8xf32>
    %114 = vector.multi_reduction <add>, %113, %cst_77 [1] : vector<8x512xf32> to vector<8xf32>
    %115 = vector.shape_cast %114 : vector<8xf32> to vector<8x1xf32>
    %116 = arith.mulf %113, %113 : vector<8x512xf32>
    %cst_78 = arith.constant dense<0.000000e+00> : vector<8xf32>
    %117 = vector.multi_reduction <add>, %116, %cst_78 [1] : vector<8x512xf32> to vector<8xf32>
    %118 = vector.shape_cast %117 : vector<8xf32> to vector<8x1xf32>
    %cst_79 = arith.constant 0.001953125 : f32
    %119 = vector.broadcast %cst_79 : f32 to vector<8x1xf32>
    %120 = arith.mulf %115, %119 : vector<8x1xf32>
    %cst_80 = arith.constant 0.001953125 : f32
    %121 = vector.broadcast %cst_80 : f32 to vector<8x1xf32>
    %122 = arith.mulf %118, %121 : vector<8x1xf32>
    %123 = arith.mulf %120, %120 : vector<8x1xf32>
    %124 = arith.subf %122, %123 : vector<8x1xf32>
    %c0_81 = arith.constant 0 : index
    %c0_82 = arith.constant 0 : index
    %125 = vector.load %arg2[%c0_81, %c0_82] : memref<8x1xf32, #tpu.memory_space<vmem>>, vector<8x1xf32>
    %cst_83 = arith.constant 9.99999974E-6 : f32
    %126 = vector.broadcast %cst_83 : f32 to vector<8x1xf32>
    %127 = arith.addf %124, %126 : vector<8x1xf32>
    %128 = math.rsqrt %127 : vector<8x1xf32>
    %129 = arith.mulf %125, %128 : vector<8x1xf32>
    %c0_84 = arith.constant 0 : index
    %c0_85 = arith.constant 0 : index
    %130 = vector.load %arg3[%c0_84, %c0_85] : memref<8x1xf32, #tpu.memory_space<vmem>>, vector<8x1xf32>
    %131 = arith.mulf %120, %129 : vector<8x1xf32>
    %132 = arith.subf %130, %131 : vector<8x1xf32>
    %133 = vector.broadcast %129 : vector<8x1xf32> to vector<8x512xf32>
    %134 = arith.mulf %113, %133 : vector<8x512xf32>
    %135 = vector.broadcast %132 : vector<8x1xf32> to vector<8x512xf32>
    %136 = arith.addf %134, %135 : vector<8x512xf32>
    %cst_86 = arith.constant 0.000000e+00 : f32
    %137 = vector.broadcast %cst_86 : f32 to vector<8x512xf32>
    %138 = arith.maximumf %136, %137 : vector<8x512xf32>
    %139 = vector.extract_strided_slice %138 {offsets = [0, 0], sizes = [8, 256], strides = [1, 1]} : vector<8x512xf32> to vector<8x256xf32>
    %c0_87 = arith.constant 0 : index
    %c17_88 = arith.constant 17 : index
    %140 = vector.load %arg8[%c0_87, %c17_88] : memref<8x580xf32, #tpu.memory_space<vmem>>, vector<8x256xf32>
    tpu.vector_store %arg8[%c0_87, %c17_88], %139 {strides = array<i32>} : memref<8x580xf32, #tpu.memory_space<vmem>>, vector<8x256xf32>,
    %141 = vector.extract_strided_slice %138 {offsets = [0, 256], sizes = [8, 256], strides = [1, 1]} : vector<8x512xf32> to vector<8x256xf32>
    %c0_89 = arith.constant 0 : index
    %c307_90 = arith.constant 307 : index
    %142 = vector.load %arg8[%c0_89, %c307_90] : memref<8x580xf32, #tpu.memory_space<vmem>>, vector<8x256xf32>
    tpu.vector_store %arg8[%c0_89, %c307_90], %141 {strides = array<i32>} : memref<8x580xf32, #tpu.memory_space<vmem>>, vector<8x256xf32>,
    %c0_91 = arith.constant 0 : index
    %c0_92 = arith.constant 0 : index
    %143 = vector.load %arg8[%c0_91, %c0_92] : memref<8x580xf32, #tpu.memory_space<vmem>>, vector<8x256xf32>
    %cst_93 = arith.constant 0.000000e+00 : f32
    %144 = vector.shape_cast %18 : vector<1x256xi1> to vector<1x256xi1>
    %145 = vector.broadcast %144 : vector<1x256xi1> to vector<8x256xi1>
    %146 = vector.broadcast %cst_93 : f32 to vector<8x256xf32>
    %147 = arith.select %145, %143, %146 : vector<8x256xi1>, vector<8x256xf32>
    %c0_94 = arith.constant 0 : index
    %c0_95 = arith.constant 0 : index
    %148 = vector.load %arg9[%c0_94, %c0_95] : memref<72x512xf32, #tpu.memory_space<vmem>>, vector<8x256xf32>
    tpu.vector_store %arg9[%c0_94, %c0_95], %147 {strides = array<i32>} : memref<72x512xf32, #tpu.memory_space<vmem>>, vector<8x256xf32>,
    %c0_96 = arith.constant 0 : index
    %c1_97 = arith.constant 1 : index
    %149 = vector.load %arg8[%c0_96, %c1_97] : memref<8x580xf32, #tpu.memory_space<vmem>>, vector<8x256xf32>
    %c8_98 = arith.constant 8 : index
    %c0_99 = arith.constant 0 : index
    %150 = vector.load %arg9[%c8_98, %c0_99] : memref<72x512xf32, #tpu.memory_space<vmem>>, vector<8x256xf32>
    tpu.vector_store %arg9[%c8_98, %c0_99], %149 {strides = array<i32>} : memref<72x512xf32, #tpu.memory_space<vmem>>, vector<8x256xf32>,
    %c0_100 = arith.constant 0 : index
    %c2_101 = arith.constant 2 : index
    %151 = vector.load %arg8[%c0_100, %c2_101] : memref<8x580xf32, #tpu.memory_space<vmem>>, vector<8x256xf32>
    %cst_102 = arith.constant 0.000000e+00 : f32
    %152 = vector.shape_cast %20 : vector<1x256xi1> to vector<1x256xi1>
    %153 = vector.broadcast %152 : vector<1x256xi1> to vector<8x256xi1>
    %154 = vector.broadcast %cst_102 : f32 to vector<8x256xf32>
    %155 = arith.select %153, %151, %154 : vector<8x256xi1>, vector<8x256xf32>
    %c16_103 = arith.constant 16 : index
    %c0_104 = arith.constant 0 : index
    %156 = vector.load %arg9[%c16_103, %c0_104] : memref<72x512xf32, #tpu.memory_space<vmem>>, vector<8x256xf32>
    tpu.vector_store %arg9[%c16_103, %c0_104], %155 {strides = array<i32>} : memref<72x512xf32, #tpu.memory_space<vmem>>, vector<8x256xf32>,
    %c0_105 = arith.constant 0 : index
    %c16_106 = arith.constant 16 : index
    %157 = vector.load %arg8[%c0_105, %c16_106] : memref<8x580xf32, #tpu.memory_space<vmem>>, vector<8x256xf32>
    %cst_107 = arith.constant 0.000000e+00 : f32
    %158 = vector.shape_cast %18 : vector<1x256xi1> to vector<1x256xi1>
    %159 = vector.broadcast %158 : vector<1x256xi1> to vector<8x256xi1>
    %160 = vector.broadcast %cst_107 : f32 to vector<8x256xf32>
    %161 = arith.select %159, %157, %160 : vector<8x256xi1>, vector<8x256xf32>
    %c24_108 = arith.constant 24 : index
    %c0_109 = arith.constant 0 : index
    %162 = vector.load %arg9[%c24_108, %c0_109] : memref<72x512xf32, #tpu.memory_space<vmem>>, vector<8x256xf32>
    tpu.vector_store %arg9[%c24_108, %c0_109], %161 {strides = array<i32>} : memref<72x512xf32, #tpu.memory_space<vmem>>, vector<8x256xf32>,
    %c0_110 = arith.constant 0 : index
    %c17_111 = arith.constant 17 : index
    %163 = vector.load %arg8[%c0_110, %c17_111] : memref<8x580xf32, #tpu.memory_space<vmem>>, vector<8x256xf32>
    %c32_112 = arith.constant 32 : index
    %c0_113 = arith.constant 0 : index
    %164 = vector.load %arg9[%c32_112, %c0_113] : memref<72x512xf32, #tpu.memory_space<vmem>>, vector<8x256xf32>
    tpu.vector_store %arg9[%c32_112, %c0_113], %163 {strides = array<i32>} : memref<72x512xf32, #tpu.memory_space<vmem>>, vector<8x256xf32>,
    %c0_114 = arith.constant 0 : index
    %c18_115 = arith.constant 18 : index
    %165 = vector.load %arg8[%c0_114, %c18_115] : memref<8x580xf32, #tpu.memory_space<vmem>>, vector<8x256xf32>
    %cst_116 = arith.constant 0.000000e+00 : f32
    %166 = vector.shape_cast %20 : vector<1x256xi1> to vector<1x256xi1>
    %167 = vector.broadcast %166 : vector<1x256xi1> to vector<8x256xi1>
    %168 = vector.broadcast %cst_116 : f32 to vector<8x256xf32>
    %169 = arith.select %167, %165, %168 : vector<8x256xi1>, vector<8x256xf32>
    %c40_117 = arith.constant 40 : index
    %c0_118 = arith.constant 0 : index
    %170 = vector.load %arg9[%c40_117, %c0_118] : memref<72x512xf32, #tpu.memory_space<vmem>>, vector<8x256xf32>
    tpu.vector_store %arg9[%c40_117, %c0_118], %169 {strides = array<i32>} : memref<72x512xf32, #tpu.memory_space<vmem>>, vector<8x256xf32>,
    %c0_119 = arith.constant 0 : index
    %c32_120 = arith.constant 32 : index
    %171 = vector.load %arg8[%c0_119, %c32_120] : memref<8x580xf32, #tpu.memory_space<vmem>>, vector<8x256xf32>
    %cst_121 = arith.constant 0.000000e+00 : f32
    %172 = vector.shape_cast %18 : vector<1x256xi1> to vector<1x256xi1>
    %173 = vector.broadcast %172 : vector<1x256xi1> to vector<8x256xi1>
    %174 = vector.broadcast %cst_121 : f32 to vector<8x256xf32>
    %175 = arith.select %173, %171, %174 : vector<8x256xi1>, vector<8x256xf32>
    %c48_122 = arith.constant 48 : index
    %c0_123 = arith.constant 0 : index
    %176 = vector.load %arg9[%c48_122, %c0_123] : memref<72x512xf32, #tpu.memory_space<vmem>>, vector<8x256xf32>
    tpu.vector_store %arg9[%c48_122, %c0_123], %175 {strides = array<i32>} : memref<72x512xf32, #tpu.memory_space<vmem>>, vector<8x256xf32>,
    %c0_124 = arith.constant 0 : index
    %c33_125 = arith.constant 33 : index
    %177 = vector.load %arg8[%c0_124, %c33_125] : memref<8x580xf32, #tpu.memory_space<vmem>>, vector<8x256xf32>
    %c56_126 = arith.constant 56 : index
    %c0_127 = arith.constant 0 : index
    %178 = vector.load %arg9[%c56_126, %c0_127] : memref<72x512xf32, #tpu.memory_space<vmem>>, vector<8x256xf32>
    tpu.vector_store %arg9[%c56_126, %c0_127], %177 {strides = array<i32>} : memref<72x512xf32, #tpu.memory_space<vmem>>, vector<8x256xf32>,
    %c0_128 = arith.constant 0 : index
    %c34_129 = arith.constant 34 : index
    %179 = vector.load %arg8[%c0_128, %c34_129] : memref<8x580xf32, #tpu.memory_space<vmem>>, vector<8x256xf32>
    %cst_130 = arith.constant 0.000000e+00 : f32
    %180 = vector.shape_cast %20 : vector<1x256xi1> to vector<1x256xi1>
    %181 = vector.broadcast %180 : vector<1x256xi1> to vector<8x256xi1>
    %182 = vector.broadcast %cst_130 : f32 to vector<8x256xf32>
    %183 = arith.select %181, %179, %182 : vector<8x256xi1>, vector<8x256xf32>
    %c64_131 = arith.constant 64 : index
    %c0_132 = arith.constant 0 : index
    %184 = vector.load %arg9[%c64_131, %c0_132] : memref<72x512xf32, #tpu.memory_space<vmem>>, vector<8x256xf32>
    tpu.vector_store %arg9[%c64_131, %c0_132], %183 {strides = array<i32>} : memref<72x512xf32, #tpu.memory_space<vmem>>, vector<8x256xf32>,
    %c0_133 = arith.constant 0 : index
    %c290_134 = arith.constant 290 : index
    %185 = vector.load %arg8[%c0_133, %c290_134] : memref<8x580xf32, #tpu.memory_space<vmem>>, vector<8x256xf32>
    %cst_135 = arith.constant 0.000000e+00 : f32
    %186 = vector.shape_cast %18 : vector<1x256xi1> to vector<1x256xi1>
    %187 = vector.broadcast %186 : vector<1x256xi1> to vector<8x256xi1>
    %188 = vector.broadcast %cst_135 : f32 to vector<8x256xf32>
    %189 = arith.select %187, %185, %188 : vector<8x256xi1>, vector<8x256xf32>
    %c0_136 = arith.constant 0 : index
    %c256_137 = arith.constant 256 : index
    %190 = vector.load %arg9[%c0_136, %c256_137] : memref<72x512xf32, #tpu.memory_space<vmem>>, vector<8x256xf32>
    tpu.vector_store %arg9[%c0_136, %c256_137], %189 {strides = array<i32>} : memref<72x512xf32, #tpu.memory_space<vmem>>, vector<8x256xf32>,
    %c0_138 = arith.constant 0 : index
    %c291_139 = arith.constant 291 : index
    %191 = vector.load %arg8[%c0_138, %c291_139] : memref<8x580xf32, #tpu.memory_space<vmem>>, vector<8x256xf32>
    %c8_140 = arith.constant 8 : index
    %c256_141 = arith.constant 256 : index
    %192 = vector.load %arg9[%c8_140, %c256_141] : memref<72x512xf32, #tpu.memory_space<vmem>>, vector<8x256xf32>
    tpu.vector_store %arg9[%c8_140, %c256_141], %191 {strides = array<i32>} : memref<72x512xf32, #tpu.memory_space<vmem>>, vector<8x256xf32>,
    %c0_142 = arith.constant 0 : index
    %c292_143 = arith.constant 292 : index
    %193 = vector.load %arg8[%c0_142, %c292_143] : memref<8x580xf32, #tpu.memory_space<vmem>>, vector<8x256xf32>
    %cst_144 = arith.constant 0.000000e+00 : f32
    %194 = vector.shape_cast %20 : vector<1x256xi1> to vector<1x256xi1>
    %195 = vector.broadcast %194 : vector<1x256xi1> to vector<8x256xi1>
    %196 = vector.broadcast %cst_144 : f32 to vector<8x256xf32>
    %197 = arith.select %195, %193, %196 : vector<8x256xi1>, vector<8x256xf32>
    %c16_145 = arith.constant 16 : index
    %c256_146 = arith.constant 256 : index
    %198 = vector.load %arg9[%c16_145, %c256_146] : memref<72x512xf32, #tpu.memory_space<vmem>>, vector<8x256xf32>
    tpu.vector_store %arg9[%c16_145, %c256_146], %197 {strides = array<i32>} : memref<72x512xf32, #tpu.memory_space<vmem>>, vector<8x256xf32>,
    %c0_147 = arith.constant 0 : index
    %c306_148 = arith.constant 306 : index
    %199 = vector.load %arg8[%c0_147, %c306_148] : memref<8x580xf32, #tpu.memory_space<vmem>>, vector<8x256xf32>
    %cst_149 = arith.constant 0.000000e+00 : f32
    %200 = vector.shape_cast %18 : vector<1x256xi1> to vector<1x256xi1>
    %201 = vector.broadcast %200 : vector<1x256xi1> to vector<8x256xi1>
    %202 = vector.broadcast %cst_149 : f32 to vector<8x256xf32>
    %203 = arith.select %201, %199, %202 : vector<8x256xi1>, vector<8x256xf32>
    %c24_150 = arith.constant 24 : index
    %c256_151 = arith.constant 256 : index
    %204 = vector.load %arg9[%c24_150, %c256_151] : memref<72x512xf32, #tpu.memory_space<vmem>>, vector<8x256xf32>
    tpu.vector_store %arg9[%c24_150, %c256_151], %203 {strides = array<i32>} : memref<72x512xf32, #tpu.memory_space<vmem>>, vector<8x256xf32>,
    %c0_152 = arith.constant 0 : index
    %c307_153 = arith.constant 307 : index
    %205 = vector.load %arg8[%c0_152, %c307_153] : memref<8x580xf32, #tpu.memory_space<vmem>>, vector<8x256xf32>
    %c32_154 = arith.constant 32 : index
    %c256_155 = arith.constant 256 : index
    %206 = vector.load %arg9[%c32_154, %c256_155] : memref<72x512xf32, #tpu.memory_space<vmem>>, vector<8x256xf32>
    tpu.vector_store %arg9[%c32_154, %c256_155], %205 {strides = array<i32>} : memref<72x512xf32, #tpu.memory_space<vmem>>, vector<8x256xf32>,
    %c0_156 = arith.constant 0 : index
    %c308_157 = arith.constant 308 : index
    %207 = vector.load %arg8[%c0_156, %c308_157] : memref<8x580xf32, #tpu.memory_space<vmem>>, vector<8x256xf32>
    %cst_158 = arith.constant 0.000000e+00 : f32
    %208 = vector.shape_cast %20 : vector<1x256xi1> to vector<1x256xi1>
    %209 = vector.broadcast %208 : vector<1x256xi1> to vector<8x256xi1>
    %210 = vector.broadcast %cst_158 : f32 to vector<8x256xf32>
    %211 = arith.select %209, %207, %210 : vector<8x256xi1>, vector<8x256xf32>
    %c40_159 = arith.constant 40 : index
    %c256_160 = arith.constant 256 : index
    %212 = vector.load %arg9[%c40_159, %c256_160] : memref<72x512xf32, #tpu.memory_space<vmem>>, vector<8x256xf32>
    tpu.vector_store %arg9[%c40_159, %c256_160], %211 {strides = array<i32>} : memref<72x512xf32, #tpu.memory_space<vmem>>, vector<8x256xf32>,
    %c0_161 = arith.constant 0 : index
    %c322_162 = arith.constant 322 : index
    %213 = vector.load %arg8[%c0_161, %c322_162] : memref<8x580xf32, #tpu.memory_space<vmem>>, vector<8x256xf32>
    %cst_163 = arith.constant 0.000000e+00 : f32
    %214 = vector.shape_cast %18 : vector<1x256xi1> to vector<1x256xi1>
    %215 = vector.broadcast %214 : vector<1x256xi1> to vector<8x256xi1>
    %216 = vector.broadcast %cst_163 : f32 to vector<8x256xf32>
    %217 = arith.select %215, %213, %216 : vector<8x256xi1>, vector<8x256xf32>
    %c48_164 = arith.constant 48 : index
    %c256_165 = arith.constant 256 : index
    %218 = vector.load %arg9[%c48_164, %c256_165] : memref<72x512xf32, #tpu.memory_space<vmem>>, vector<8x256xf32>
    tpu.vector_store %arg9[%c48_164, %c256_165], %217 {strides = array<i32>} : memref<72x512xf32, #tpu.memory_space<vmem>>, vector<8x256xf32>,
    %c0_166 = arith.constant 0 : index
    %c323_167 = arith.constant 323 : index
    %219 = vector.load %arg8[%c0_166, %c323_167] : memref<8x580xf32, #tpu.memory_space<vmem>>, vector<8x256xf32>
    %c56_168 = arith.constant 56 : index
    %c256_169 = arith.constant 256 : index
    %220 = vector.load %arg9[%c56_168, %c256_169] : memref<72x512xf32, #tpu.memory_space<vmem>>, vector<8x256xf32>
    tpu.vector_store %arg9[%c56_168, %c256_169], %219 {strides = array<i32>} : memref<72x512xf32, #tpu.memory_space<vmem>>, vector<8x256xf32>,
    %c0_170 = arith.constant 0 : index
    %c324_171 = arith.constant 324 : index
    %221 = vector.load %arg8[%c0_170, %c324_171] : memref<8x580xf32, #tpu.memory_space<vmem>>, vector<8x256xf32>
    %cst_172 = arith.constant 0.000000e+00 : f32
    %222 = vector.shape_cast %20 : vector<1x256xi1> to vector<1x256xi1>
    %223 = vector.broadcast %222 : vector<1x256xi1> to vector<8x256xi1>
    %224 = vector.broadcast %cst_172 : f32 to vector<8x256xf32>
    %225 = arith.select %223, %221, %224 : vector<8x256xi1>, vector<8x256xf32>
    %c64_173 = arith.constant 64 : index
    %c256_174 = arith.constant 256 : index
    %226 = vector.load %arg9[%c64_173, %c256_174] : memref<72x512xf32, #tpu.memory_space<vmem>>, vector<8x256xf32>
    tpu.vector_store %arg9[%c64_173, %c256_174], %225 {strides = array<i32>} : memref<72x512xf32, #tpu.memory_space<vmem>>, vector<8x256xf32>,
    %c0_175 = arith.constant 0 : index
    %c0_176 = arith.constant 0 : index
    %227 = vector.load %arg4[%c0_175, %c0_176] : memref<8x72xf32, #tpu.memory_space<vmem>>, vector<8x72xf32>
    %c0_177 = arith.constant 0 : index
    %c0_178 = arith.constant 0 : index
    %228 = vector.load %arg9[%c0_177, %c0_178] : memref<72x512xf32, #tpu.memory_space<vmem>>, vector<72x512xf32>
    %cst_179 = arith.constant dense<0.000000e+00> : vector<8x512xf32>
    %229 = tpu.matmul %227, %228, %cst_179 {dimension_numbers = #tpu.dot_dimension_numbers<[1], [0], [0], [1], [0, 0, 1, 1], [], []>} : vector<8x72xf32>, vector<72x512xf32>, vector<8x512xf32> -> vector<8x512xf32>
    %cst_180 = arith.constant dense<0.000000e+00> : vector<8xf32>
    %230 = vector.multi_reduction <add>, %229, %cst_180 [1] : vector<8x512xf32> to vector<8xf32>
    %231 = vector.shape_cast %230 : vector<8xf32> to vector<8x1xf32>
    %232 = arith.mulf %229, %229 : vector<8x512xf32>
    %cst_181 = arith.constant dense<0.000000e+00> : vector<8xf32>
    %233 = vector.multi_reduction <add>, %232, %cst_181 [1] : vector<8x512xf32> to vector<8xf32>
    %234 = vector.shape_cast %233 : vector<8xf32> to vector<8x1xf32>
    %cst_182 = arith.constant 0.001953125 : f32
    %235 = vector.broadcast %cst_182 : f32 to vector<8x1xf32>
    %236 = arith.mulf %231, %235 : vector<8x1xf32>
    %cst_183 = arith.constant 0.001953125 : f32
    %237 = vector.broadcast %cst_183 : f32 to vector<8x1xf32>
    %238 = arith.mulf %234, %237 : vector<8x1xf32>
    %239 = arith.mulf %236, %236 : vector<8x1xf32>
    %240 = arith.subf %238, %239 : vector<8x1xf32>
    %c0_184 = arith.constant 0 : index
    %c0_185 = arith.constant 0 : index
    %241 = vector.load %arg5[%c0_184, %c0_185] : memref<8x1xf32, #tpu.memory_space<vmem>>, vector<8x1xf32>
    %cst_186 = arith.constant 9.99999974E-6 : f32
    %242 = vector.broadcast %cst_186 : f32 to vector<8x1xf32>
    %243 = arith.addf %240, %242 : vector<8x1xf32>
    %244 = math.rsqrt %243 : vector<8x1xf32>
    %245 = arith.mulf %241, %244 : vector<8x1xf32>
    %c0_187 = arith.constant 0 : index
    %c0_188 = arith.constant 0 : index
    %246 = vector.load %arg6[%c0_187, %c0_188] : memref<8x1xf32, #tpu.memory_space<vmem>>, vector<8x1xf32>
    %247 = arith.mulf %236, %245 : vector<8x1xf32>
    %248 = arith.subf %246, %247 : vector<8x1xf32>
    %249 = vector.broadcast %245 : vector<8x1xf32> to vector<8x512xf32>
    %250 = arith.mulf %229, %249 : vector<8x512xf32>
    %251 = vector.broadcast %248 : vector<8x1xf32> to vector<8x512xf32>
    %252 = arith.addf %250, %251 : vector<8x512xf32>
    %cst_189 = arith.constant 0.000000e+00 : f32
    %253 = vector.broadcast %cst_189 : f32 to vector<8x512xf32>
    %254 = arith.maximumf %252, %253 : vector<8x512xf32>
    %255 = vector.extract_strided_slice %254 {offsets = [0, 0], sizes = [8, 256], strides = [1, 1]} : vector<8x512xf32> to vector<8x256xf32>
    %c0_190 = arith.constant 0 : index
    %c0_191 = arith.constant 0 : index
    %256 = vector.load %arg7[%c0_190, %c0_191] : memref<16x256xf32, #tpu.memory_space<vmem>>, vector<8x256xf32>
    tpu.vector_store %arg7[%c0_190, %c0_191], %255 {strides = array<i32>} : memref<16x256xf32, #tpu.memory_space<vmem>>, vector<8x256xf32>,
    %257 = vector.extract_strided_slice %254 {offsets = [0, 256], sizes = [8, 256], strides = [1, 1]} : vector<8x512xf32> to vector<8x256xf32>
    %c8_192 = arith.constant 8 : index
    %c0_193 = arith.constant 0 : index
    %258 = vector.load %arg7[%c8_192, %c0_193] : memref<16x256xf32, #tpu.memory_space<vmem>>, vector<8x256xf32>
    tpu.vector_store %arg7[%c8_192, %c0_193], %257 {strides = array<i32>} : memref<16x256xf32, #tpu.memory_space<vmem>>, vector<8x256xf32>,
    return
  }
}

</mosaic_0001>

<bundles_post_ra>
// kernel: tpu_custom_call.1
= control target key start
LH: loop header
LB: loop body
LE: loop exit
PB: predicated region body
PF: predicated region fallthrough
CT: control target
= control target key end

     0   :  { %s1404_s26 = smov 17   ;;  %v1405_v5 = vmov 0.0   ;;  %vm62_vm0 = vcmask 556032   ;;  %s1406_s10 = smov 51   ;;  %s1908_s0 = inlined_call_operand.vmem [shape: f32[8,256], index: 0, kind: input, shape index: {}]   ;;  %s1909_s1 = inlined_call_operand.vmem [shape: f32[8,72], index: 1, kind: input, shape index: {}]   ;;  %s1910_s2 = inlined_call_operand.vmem [shape: f32[8,1], index: 2, kind: input, shape index: {}]   ;;  %s1911_s3 = inlined_call_operand.vmem [shape: f32[8,1], index: 3, kind: input, shape index: {}]   ;;  %s1912_s4 = inlined_call_operand.vmem [shape: f32[8,72], index: 4, kind: input, shape index: {}]   ;;  %s1913_s5 = inlined_call_operand.vmem [shape: f32[8,1], index: 5, kind: input, shape index: {}]   ;;  %s1914_s6 = inlined_call_operand.vmem [shape: f32[8,1], index: 6, kind: input, shape index: {}]   ;;  %s1915_s7 = inlined_call_operand.hbm [shape: f32[16,256], index: 7, kind: output, shape index: {}]  }
   0x1   :  { %v64_v0 = vld [vmem:[%s1908_s0] sm:$0xf]  ;;  %v82_v1 = vld [vmem:[%s1908_s0] sm:$0xf0]  ;;  %v83_v2 = vld [vmem:[%s1908_s0 + $0x8] sm:$0xf0]  ;;  %565 = vmatprep.mubr.f32.mxu0 %v1405_v5  ;;  %636 = vmatprep.mubr.f32.mxu1 %v1405_v5 }
   0x2   :  { %68 = vrot.lane.b32.xlu0 %v64_v0, %s1404_s26  ;;  %v65_v3 = vld [vmem:[%s1908_s0 + $0x8] sm:$0xf]  ;;  %v86_v4 = vrot.slane %v82_v1, 4  ;;  %58 = vst [vmem:[#allocation2] sm:$0xff] %v1405_v5  ;;  %59 = vst [vmem:[#allocation2 + $0x8] sm:$0xff] %v1405_v5  ;;  %v87_v6 = vrot.slane %v83_v2, 4 }
   0x3   :  { %60 = vst [vmem:[#allocation2 + $0x10] sm:$0xff] %v1405_v5  ;;  %61 = vst [vmem:[#allocation2 + $0x18] sm:$0xff] %v1405_v5 }
   0x4   :  { %88 = vrot.lane.b32.xlu1 %v86_v4, %s1406_s10  ;;  %63 = vst.msk [vmem:[#allocation2 + $0x20] sm:$0xff] %vm62_vm0, %v1405_v5 }
   0x5   :  { %12 = vsyncpa [#allocation5], 0  ;;  %vm77_vm1 = vcmask 1043592   ;;  %vm72_vm2 = vcmask 138240   ;;  %vm80_vm3 = vcmask 134144   ;;  %vm97_vm4 = vcmask 1043864  }
   0x6   :  { %70 = vrot.lane.b32.xlu0 %v65_v3, %s1404_s26  ;;  %vm92_vm5 = vcmask 416768   ;;  %vm100_vm6 = vcmask 412672   ;;  %s1407_s0 = smov 94   ;;  %s1408_s11 = smov 95   ;;  %v27_v24 = vlaneseq  ;;  %vm269_vm7 = vcmask 769024  }
   0x7   :  { %s1409_s12 = smov 96   ;;  %s1410_s13 = smov 110   ;;  %vm250_vm10 = vcmask 777216   ;;  %vm229_vm11 = vcmask 785408   ;;  %vm208_vm13 = vcmask 900096   ;;  %vm1920_vm15 = vcmask 908288  }
   0x8   :  { %90 = vrot.lane.b32.xlu1 %v87_v6, %s1406_s10  ;;  %s1411_s14 = smov 111   ;;  %s1412_s15 = smov 112   ;;  %v28_v27 = vand.u32 127, %v27_v24  ;;  %vm1917_vm0 = vcmask 916480  }
   0x9   :  { %s1413_s16 = smov 60   ;;  %s1414_s17 = smov 126  }
   0xa   :  { %s1415_s18 = smov 127   ;;  %s1416_s19 = smov 61   ;;  %v29_v30 = vadd.s32 128, %v28_v27  ;;  %v34_v35 = vand.u32 15, %v28_v27 }
   0xb   :  { %s1417_s20 = smov 62   ;;  %s1418_s21 = smov 76  }
   0xc   :  { %s1419_s22 = smov 92   ;;  %s1420_s23 = smov 93   ;;  %v41_v33 = vand.u32 15, %v29_v30  ;;  %vm1575_vm9 = vcmp.le.s32.totalorder %v34_v35, 14  ;;  %vm1601_vm14 = vcmp.ge.s32.totalorder %v34_v35, 1 }
   0xd   :  { %s1421_s24 = smov 77   ;;  %s1422_s25 = smov 78  }
   0xe   :  { %vm1571_vm8 = vcmp.le.s32.totalorder %v41_v33, 14  ;;  %vm1596_vm12 = vcmp.ge.s32.totalorder %v41_v33, 1 }
  0x74   :  { %v69_v7 = vpop.permute.xlu0 %68 }
  0x75   :  { %78 = vst.msk [vmem:[#allocation2] sm:$0xf] %vm77_vm1, %v69_v7  ;;  %vm1916_vm1 = vcmask 1031168  }
  0x76   :  { %v89_v8 = vpop.permute.xlu1 %88 }
  0x78   :  { %v71_v9 = vpop.permute.xlu0 %70 }
  0x79   :  { %v73_v10 = vsel %vm72_vm2, %v69_v7, %v71_v9  ;;  %81 = vst.msk [vmem:[#allocation2 + $0x10] sm:$0xf] %vm80_vm3, %v71_v9  ;;  %vm451_vm3 = vcmask 490496  }
  0x7a   :  { %79 = vst [vmem:[#allocation2 + $0x8] sm:$0xf] %v73_v10  ;;  %98 = vst.msk [vmem:[#allocation2 + $0x10] sm:$0xf] %vm97_vm4, %v89_v8  ;;  %v91_v11 = vpop.permute.xlu1 %90  ;;  %vm1922_vm4 = vcmask 498688  }
  0x7b   :  { %v93_v13 = vsel %vm92_vm5, %v89_v8, %v91_v11  ;;  %101 = vst.msk [vmem:[#allocation2 + $0x20] sm:$0xf] %vm100_vm6, %v91_v11  ;;  %vm1918_vm6 = vcmask 1039360  }
  0x7c   :  { %v1491_v12 = vld [vmem:[#allocation2] sm:$0xff]  ;;  %99 = vst [vmem:[#allocation2 + $0x18] sm:$0xf] %v93_v13 }
  0x7d   :  { %263 = vrot.lane.b32.xlu0 %v1491_v12, %s1407_s0  ;;  %244 = vrot.lane.b32.xlu1 %v1491_v12, %s1408_s11 }
  0x81   :  { %223 = vrot.lane.b32.xlu0 %v1491_v12, %s1409_s12  ;;  %v1500_v14 = vld [vmem:[#allocation2 + $0x8] sm:$0xff]  ;;  %v259_v15 = vld [vmem:[#allocation2 + $0x10] sm:$0xff] }
  0x82   :  { %246 = vrot.lane.b32.xlu1 %v1500_v14, %s1408_s11  ;;  %v441_v16 = vld [vmem:[#allocation2 + $0x20] sm:$0xff] }
  0x83   :  { %v440_v17 = vld [vmem:[#allocation2 + $0x18] sm:$0xff] }
  0x85   :  { %202 = vrot.lane.b32.xlu0 %v1491_v12, %s1410_s13 }
  0x86   :  { %267 = vrot.lane.b32.xlu1 %v259_v15, %s1407_s0 }
  0x89   :  { %183 = vrot.lane.b32.xlu0 %v1491_v12, %s1411_s14 }
  0x8a   :  { %227 = vrot.lane.b32.xlu1 %v259_v15, %s1409_s12 }
  0x8d   :  { %162 = vrot.lane.b32.xlu0 %v1491_v12, %s1412_s15 }
  0x8e   :  { %449 = vrot.lane.b32.xlu1 %v441_v16, %s1413_s16 }
  0x91   :  { %141 = vrot.lane.b32.xlu0 %v1491_v12, %s1414_s17 }
  0x92   :  { %445 = vrot.lane.b32.xlu1 %v259_v15, %s1413_s16 }
  0x95   :  { %118 = vrot.lane.b32.xlu0 %v1491_v12, %s1415_s18 }
  0x96   :  { %206 = vrot.lane.b32.xlu1 %v259_v15, %s1410_s13 }
  0x99   :  { %265 = vrot.lane.b32.xlu0 %v1500_v14, %s1407_s0 }
  0x9a   :  { %430 = vrot.lane.b32.xlu1 %v441_v16, %s1416_s19 }
  0x9d   :  { %225 = vrot.lane.b32.xlu0 %v1500_v14, %s1409_s12 }
  0x9e   :  { %426 = vrot.lane.b32.xlu1 %v259_v15, %s1416_s19 }
  0xa1   :  { %204 = vrot.lane.b32.xlu0 %v1500_v14, %s1410_s13 }
  0xa2   :  { %187 = vrot.lane.b32.xlu1 %v259_v15, %s1411_s14 }
  0xa5   :  { %185 = vrot.lane.b32.xlu0 %v1500_v14, %s1411_s14 }
  0xa6   :  { %409 = vrot.lane.b32.xlu1 %v441_v16, %s1417_s20 }
  0xa9   :  { %164 = vrot.lane.b32.xlu0 %v1500_v14, %s1412_s15 }
  0xaa   :  { %405 = vrot.lane.b32.xlu1 %v259_v15, %s1417_s20 }
  0xad   :  { %143 = vrot.lane.b32.xlu0 %v1500_v14, %s1414_s17 }
  0xae   :  { %166 = vrot.lane.b32.xlu1 %v259_v15, %s1412_s15 }
  0xb1   :  { %120 = vrot.lane.b32.xlu0 %v1500_v14, %s1415_s18 }
  0xb2   :  { %388 = vrot.lane.b32.xlu1 %v441_v16, %s1418_s21 }
  0xb5   :  { %248 = vrot.lane.b32.xlu0 %v259_v15, %s1408_s11 }
  0xb6   :  { %384 = vrot.lane.b32.xlu1 %v259_v15, %s1418_s21 }
  0xb9   :  { %323 = vrot.lane.b32.xlu0 %v259_v15, %s1419_s22 }
  0xba   :  { %145 = vrot.lane.b32.xlu1 %v259_v15, %s1414_s17 }
  0xbd   :  { %308 = vrot.lane.b32.xlu0 %v441_v16, %s1420_s23 }
  0xbe   :  { %369 = vrot.lane.b32.xlu1 %v441_v16, %s1421_s24 }
  0xc1   :  { %447 = vrot.lane.b32.xlu0 %v440_v17, %s1413_s16 }
  0xc2   :  { %365 = vrot.lane.b32.xlu1 %v259_v15, %s1421_s24 }
  0xc5   :  { %428 = vrot.lane.b32.xlu0 %v440_v17, %s1416_s19 }
  0xc6   :  { %122 = vrot.lane.b32.xlu1 %v259_v15, %s1415_s18 }
  0xc9   :  { %407 = vrot.lane.b32.xlu0 %v440_v17, %s1417_s20 }
  0xca   :  { %348 = vrot.lane.b32.xlu1 %v441_v16, %s1422_s25 }
  0xcd   :  { %386 = vrot.lane.b32.xlu0 %v440_v17, %s1418_s21 }
  0xce   :  { %344 = vrot.lane.b32.xlu1 %v259_v15, %s1422_s25 }
  0xd1   :  { %367 = vrot.lane.b32.xlu0 %v440_v17, %s1421_s24 }
  0xd2   :  { %327 = vrot.lane.b32.xlu1 %v441_v16, %s1419_s22 }
  0xd5   :  { %346 = vrot.lane.b32.xlu0 %v440_v17, %s1422_s25 }
  0xd6   :  { %304 = vrot.lane.b32.xlu1 %v259_v15, %s1420_s23 }
  0xd9   :  { %325 = vrot.lane.b32.xlu0 %v440_v17, %s1419_s22 }
  0xda   :  { %306 = vrot.lane.b32.xlu1 %v440_v17, %s1420_s23 }
  0xdd   :  { %286 = vrot.lane.b32.xlu0 %v440_v17, %s1407_s0 }
  0xde   :  { %288 = vrot.lane.b32.xlu1 %v441_v16, %s1407_s0 }
  0xe1   :  { %284 = vrot.lane.b32.xlu0 %v259_v15, %s1407_s0 }
  0xef   :  { %v264_v18 = vpop.permute.xlu0 %263  ;;  %v245_v19 = vpop.permute.xlu1 %244 }
  0xf3   :  { %v224_v20 = vpop.permute.xlu0 %223 }
  0xf4   :  { %v247_v21 = vpop.permute.xlu1 %246 }
  0xf5   :  { %v251_v59 = vsel %vm250_vm10, %v245_v19, %v247_v21 }
  0xf7   :  { %v203_v22 = vpop.permute.xlu0 %202 }
  0xf8   :  { %v268_v23 = vpop.permute.xlu1 %267 }
  0xfb   :  { %v184_v25 = vpop.permute.xlu0 %183 }
  0xfc   :  { %v228_v26 = vpop.permute.xlu1 %227 }
  0xff   :  { %v163_v28 = vpop.permute.xlu0 %162 }
 0x100   :  { %v1563_v29 = vpop.permute.xlu1 %449 }
 0x103   :  { %v1565_v31 = vpop.permute.xlu0 %141 }
 0x104   :  { %v1567_v32 = vpop.permute.xlu1 %445 }
 0x107   :  { %v1569_v34 = vpop.permute.xlu0 %118 }
 0x108   :  { %v207_v36 = vpop.permute.xlu1 %206 }
 0x10b   :  { %v266_v38 = vpop.permute.xlu0 %265 }
 0x10c   :  { %v1579_v40 = vpop.permute.xlu1 %430  ;;  %v271_v41 = vsel %vm269_vm7, %v266_v38, %v268_v23  ;;  %v270_v42 = vsel %vm269_vm7, %v264_v18, %v266_v38 }
 0x10d   :  { %1305 = vmatprep.subr.msk.mxu0 %vm1571_vm8, %v271_v41 }
 0x10e   :  { %1306 = vmatpush1.msk.msra.mxu0 %vm1575_vm9, %v270_v42 }
 0x10f   :  { %v226_v43 = vpop.permute.xlu0 %225 }
 0x110   :  { %v427_v44 = vpop.permute.xlu1 %426  ;;  %v231_v61 = vsel %vm229_vm11, %v226_v43, %v228_v26  ;;  %v230_v62 = vsel %vm229_vm11, %v224_v20, %v226_v43 }
 0x113   :  { %v205_v45 = vpop.permute.xlu0 %204 }
 0x114   :  { %v188_v46 = vpop.permute.xlu1 %187  ;;  %v210_v0 = vsel %vm208_vm13, %v205_v45, %v207_v36  ;;  %v209_v2 = vsel %vm208_vm13, %v203_v22, %v205_v45 }
 0x117   :  { %v186_v47 = vpop.permute.xlu0 %185 }
 0x118   :  { %v1587_v48 = vpop.permute.xlu1 %409  ;;  %v191_v3 = vsel %vm1920_vm15, %v186_v47, %v188_v46  ;;  %v190_v6 = vsel %vm1920_vm15, %v184_v25, %v186_v47  ;;  %v460_v25 = vld [vmem:[%s1909_s1] sm:$0xff]  ;;  %vm350_vm15 = vcmask 637952  }
 0x11b   :  { %v165_v49 = vpop.permute.xlu0 %164 }
 0x11c   :  { %v1589_v50 = vpop.permute.xlu1 %405  ;;  %v169_v9 = vsel %vm1917_vm0, %v163_v28, %v165_v49 }
 0x11f   :  { %v144_v51 = vpop.permute.xlu0 %143 }
 0x120   :  { %v167_v52 = vpop.permute.xlu1 %166  ;;  %v148_v11 = vsel %vm1916_vm1, %v1565_v31, %v144_v51 }
 0x121   :  { %v170_v7 = vsel %vm1917_vm0, %v165_v49, %v167_v52  ;;  %vm497_vm0 = vcmask 588800  }
 0x123   :  { %v121_v53 = vpop.permute.xlu0 %120 }
 0x124   :  { %v1591_v54 = vpop.permute.xlu1 %388  ;;  %v125_v23 = vsel %vm1918_vm6, %v1569_v34, %v121_v53 }
 0x127   :  { %v249_v55 = vpop.permute.xlu0 %248 }
 0x128   :  { %v1593_v56 = vpop.permute.xlu1 %384  ;;  %v252_v57 = vsel %vm250_vm10, %v247_v21, %v249_v55 }
 0x129   :  { %517 = vmatprep.subr.mxu0 %v252_v57 }
 0x12a   :  { %518 = vmatpush1.msra.mxu0 %v251_v59 }
 0x12b   :  { %v1607_v63 = vpop.permute.xlu0 %323  ;;  %1307 = vmatprep.subr.msk.mxu0 %vm1596_vm12, %v231_v61 }
 0x12c   :  { %v146_v1 = vpop.permute.xlu1 %145  ;;  %1308 = vmatpush1.msk.msra.mxu0 %vm1601_vm14, %v230_v62 }
 0x12d   :  { %1309 = vmatprep.subr.msk.mxu0 %vm1571_vm8, %v210_v0  ;;  %v149_v10 = vsel %vm1916_vm1, %v144_v51, %v146_v1  ;;  %vm1919_vm1 = vcmask 506880  }
 0x12e   :  { %1310 = vmatpush1.msk.msra.mxu0 %vm1575_vm9, %v209_v2 }
 0x12f   :  { %v1620_v4 = vpop.permute.xlu0 %308  ;;  %523 = vmatprep.subr.mxu0 %v191_v3 }
 0x130   :  { %v370_v8 = vpop.permute.xlu1 %369  ;;  %524 = vmatpush1.msra.mxu0 %v190_v6 }
 0x131   :  { %1311 = vmatprep.subr.msk.mxu0 %vm1596_vm12, %v170_v7 }
 0x132   :  { %1312 = vmatpush1.msk.msra.mxu0 %vm1601_vm14, %v169_v9 }
 0x133   :  { %v448_v13 = vpop.permute.xlu0 %447  ;;  %1313 = vmatprep.subr.msk.mxu0 %vm1571_vm8, %v149_v10 }
 0x134   :  { %v366_v15 = vpop.permute.xlu1 %365  ;;  %1314 = vmatpush1.msk.msra.mxu0 %vm1575_vm9, %v148_v11  ;;  %v453_v16 = vsel %vm451_vm3, %v448_v13, %v1563_v29  ;;  %v452_v17 = vsel %vm451_vm3, %v1567_v32, %v448_v13  ;;  %v661_v13 = vld [vmem:[%s1910_s2] sm:$0xff] }
 0x135   :  { %1317 = vmatprep.subr.msk.mxu1 %vm1571_vm8, %v453_v16 }
 0x136   :  { %1318 = vmatpush1.msk.msra.mxu1 %vm1575_vm9, %v452_v17  ;;  %v665_v17 = vld [vmem:[%s1911_s3] sm:$0xff] }
 0x137   :  { %v429_v18 = vpop.permute.xlu0 %428 }
 0x138   :  { %v123_v19 = vpop.permute.xlu1 %122  ;;  %v434_v20 = vsel %vm1922_vm4, %v429_v18, %v1579_v40  ;;  %v433_v21 = vsel %vm1922_vm4, %v427_v44, %v429_v18  ;;  %vm1923_vm4 = vcmask 760832  }
 0x139   :  { %588 = vmatprep.subr.mxu1 %v434_v20  ;;  %v126_v22 = vsel %vm1918_vm6, %v121_v53, %v123_v19  ;;  %vm1921_vm6 = vcmask 621568  }
 0x13a   :  { %529 = vmatprep.subr.mxu0 %v126_v22  ;;  %589 = vmatpush1.msra.mxu1 %v433_v21 }
 0x13b   :  { %v408_v24 = vpop.permute.xlu0 %407  ;;  %530 = vmatpush1.msra.mxu0 %v125_v23 }
 0x13c   :  { %v412_v26 = vsel %vm1919_vm1, %v1589_v50, %v408_v24  ;;  %v413_v27 = vsel %vm1919_vm1, %v408_v24, %v1587_v48  ;;  %v349_v28 = vpop.permute.xlu1 %348  ;;  %1315 = vmatprep.subr.msk.mxu0 %vm1596_vm12, %v1500_v14  ;;  %vm371_vm1 = vcmask 629760  }
 0x13d   :  { %1316 = vmatpush1.msk.msra.mxu0 %vm1601_vm14, %v1491_v12  ;;  %1319 = vmatprep.subr.msk.mxu1 %vm1596_vm12, %v413_v27 }
 0x13e   :  { %1320 = vmatpush1.msk.msra.mxu1 %vm1601_vm14, %v412_v26  ;;  %1301 = vmatmul.mubr.msk.f32.vlgmr.msra.gmra.mxu0 %vm497_vm0, %v460_v25 }
 0x13f   :  { %v387_v29 = vpop.permute.xlu0 %386  ;;  %1156 = vmatprep.mubr.f32.mxu0 %v1405_v5 }
 0x140   :  { %v391_v30 = vsel %vm1921_vm6, %v1593_v56, %v387_v29  ;;  %v392_v14 = vsel %vm1921_vm6, %v387_v29, %v1591_v54  ;;  %v345_v31 = vpop.permute.xlu1 %344  ;;  %vm1924_vm6 = vcmask 752640  }
 0x141   :  { %1321 = vmatprep.subr.msk.mxu1 %vm1571_vm8, %v392_v14 }
 0x142   :  { %1322 = vmatpush1.msk.msra.mxu1 %vm1575_vm9, %v391_v30 }
 0x143   :  { %v368_v12 = vpop.permute.xlu0 %367 }
 0x144   :  { %v328_v32 = vpop.permute.xlu1 %327  ;;  %v373_v33 = vsel %vm371_vm1, %v368_v12, %v370_v8  ;;  %v372_v34 = vsel %vm371_vm1, %v366_v15, %v368_v12 }
 0x145   :  { %594 = vmatprep.subr.mxu1 %v373_v33 }
 0x146   :  { %595 = vmatpush1.msra.mxu1 %v372_v34 }
 0x147   :  { %v347_v35 = vpop.permute.xlu0 %346 }
 0x148   :  { %v351_v36 = vsel %vm350_vm15, %v345_v31, %v347_v35  ;;  %v352_v38 = vsel %vm350_vm15, %v347_v35, %v349_v28  ;;  %v305_v40 = vpop.permute.xlu1 %304 }
 0x149   :  { %1323 = vmatprep.subr.msk.mxu1 %vm1596_vm12, %v352_v38 }
 0x14a   :  { %1324 = vmatpush1.msk.msra.mxu1 %vm1601_vm14, %v351_v36 }
 0x14b   :  { %v326_v41 = vpop.permute.xlu0 %325 }
 0x14c   :  { %v330_v42 = vsel %vm1924_vm6, %v1607_v63, %v326_v41  ;;  %v331_v43 = vsel %vm1924_vm6, %v326_v41, %v328_v32  ;;  %v307_v44 = vpop.permute.xlu1 %306  ;;  %vm714_vm6 = vcmask 1047960  }
 0x14d   :  { %1325 = vmatprep.subr.msk.mxu1 %vm1571_vm8, %v331_v43  ;;  %v312_v45 = vsel %vm1923_vm4, %v307_v44, %v1620_v4  ;;  %v311_v47 = vsel %vm1923_vm4, %v305_v40, %v307_v44  ;;  %v1423_v4 = vmov 0   ;;  %vm700_vm4 = vcmask 1047688  }
 0x14e   :  { %1326 = vmatpush1.msk.msra.mxu1 %vm1575_vm9, %v330_v42  ;;  %1376 = vset.pattern.permute.xlu0 %v1423_v4 }
 0x14f   :  { %v287_v46 = vpop.permute.xlu0 %286  ;;  %600 = vmatprep.subr.mxu1 %v312_v45  ;;  %1377 = vset.pattern.permute.xlu1 %v1423_v4 }
 0x150   :  { %v289_v48 = vpop.permute.xlu1 %288  ;;  %601 = vmatpush1.msra.mxu1 %v311_v47 }
 0x151   :  { %v291_v49 = vsel %vm269_vm7, %v287_v46, %v289_v48 }
 0x152   :  { %1327 = vmatprep.subr.msk.mxu1 %vm1596_vm12, %v291_v49 }
 0x153   :  { %v285_v50 = vpop.permute.xlu0 %284 }
 0x154   :  { %v290_v51 = vsel %vm269_vm7, %v285_v50, %v287_v46 }
 0x155   :  { %1328 = vmatpush1.msk.msra.mxu1 %vm1601_vm14, %v290_v51 }
 0x156   :  { %1302 = vmatmul.mubr.msk.f32.vlgmr.msra.gmra.mxu1 %vm497_vm0, %v460_v25 }
 0x157   :  { %1227 = vmatprep.mubr.f32.mxu1 %v1405_v5 }
 0x1fe   :  { %v567_v52 = vpop.f32.mrf.mxu0 }
 0x1ff   :  { %v648_v54 = vmul.f32 %v567_v52, %v567_v52 }
 0x200   :  { %v569_v53 = vpop.f32.mrf.mxu0 }
 0x201   :  { %v649_v55 = vmul.f32 %v569_v53, %v569_v53  ;;  %v643_v56 = vadd.f32 %v569_v53, %v567_v52 }
 0x203   :  { %v652_v62 = vadd.f32 %v649_v55, %v648_v54 }
 0x216   :  { %v638_v57 = vpop.f32.mrf.mxu1 }
 0x217   :  { %v650_v59 = vmul.f32 %v638_v57, %v638_v57  ;;  %v644_v61 = vadd.f32 %v643_v56, %v638_v57 }
 0x218   :  { %v640_v63 = vpop.f32.mrf.mxu1 }
 0x219   :  { %v645_v0 = vadd.f32 %v644_v61, %v640_v63  ;;  %v651_v1 = vmul.f32 %v640_v63, %v640_v63  ;;  %v653_v2 = vadd.f32 %v652_v62, %v650_v59 }
 0x21b   :  { %646 = vadd.xlane.f32.xlu1 %v645_v0  ;;  %v654_v3 = vadd.f32 %v653_v2, %v651_v1 }
 0x21d   :  { %655 = vadd.xlane.f32.xlu0 %v654_v3 }
 0x2a4   :  { %v647_v5 = vpop.xlane.xlu1 %646 }
 0x2a5   :  { %v657_v6 = vmul.f32 0.001953125, %v647_v5 }
 0x2a6   :  { %v656_v7 = vpop.xlane.xlu0 %655 }
 0x2a7   :  { %v659_v8 = vmul.f32 %v657_v6, %v657_v6  ;;  %v658_v9 = vmul.f32 0.001953125, %v656_v7 }
 0x2a9   :  { %v660_v10 = vsub.f32 %v658_v9, %v659_v8 }
 0x2ab   :  { %v662_v11 = vadd.f32 1e-05, %v660_v10 }
 0x2ad   :  { %1378 = vrsqrt.f32 %v662_v11 }
 0x2ba   :  { %v1379_v15 = vpop.eup %1378 }
 0x2bb   :  { %v664_v16 = vmul.f32 %v1379_v15, %v661_v13 }
 0x2bd   :  { %670 = vperm.xlu0 %1376, %v664_v16   ;;  %v666_v18 = vmul.f32 %v664_v16, %v657_v6 }
 0x2bf   :  { %v667_v19 = vsub.f32 %v665_v17, %v666_v18 }
 0x2c1   :  { %679 = vperm.xlu1 %1377, %v667_v19  }
 0x338   :  { %v671_v20 = vpop.permute.xlu0 %670 }
 0x339   :  { %v673_v21 = vmul.f32 %v671_v20, %v567_v52  ;;  %v674_v23 = vmul.f32 %v671_v20, %v569_v53  ;;  %v675_v27 = vmul.f32 %v671_v20, %v638_v57  ;;  %v676_v30 = vmul.f32 %v671_v20, %v640_v63 }
 0x33c   :  { %v680_v22 = vpop.permute.xlu1 %679 }
 0x33d   :  { %v682_v24 = vadd.f32 %v680_v22, %v673_v21  ;;  %v683_v26 = vadd.f32 %v680_v22, %v674_v23  ;;  %v684_v29 = vadd.f32 %v680_v22, %v675_v27  ;;  %v685_v31 = vadd.f32 %v680_v22, %v676_v30 }
 0x33f   :  { %v686_v25 = vmax.f32 %v682_v24, 0.0  ;;  %v687_v28 = vmax.f32 %v683_v26, 0.0  ;;  %v688_v14 = vmax.f32 %v684_v29, 0.0  ;;  %v689_v12 = vmax.f32 %v685_v31, 0.0 }
 0x341   :  { %692 = vrot.lane.b32.xlu1 %v686_v25, %s1404_s26 }
 0x345   :  { %694 = vrot.lane.b32.xlu1 %v687_v28, %s1404_s26 }
 0x349   :  { %706 = vrot.lane.b32.xlu1 %v688_v14, %s1406_s10 }
 0x34d   :  { %708 = vrot.lane.b32.xlu1 %v689_v12, %s1406_s10 }
 0x3b3   :  { %v693_v32 = vpop.permute.xlu1 %692 }
 0x3b4   :  { %701 = vst.msk [vmem:[#allocation2] sm:$0xff] %vm700_vm4, %v693_v32  ;;  %vm1939_vm4 = vcmask 916480  }
 0x3b7   :  { %v695_v33 = vpop.permute.xlu1 %694 }
 0x3b8   :  { %v1714_v34 = vsel %vm72_vm2, %v693_v32, %v695_v33  ;;  %703 = vst.msk [vmem:[#allocation2 + $0x10] sm:$0xff] %vm72_vm2, %v695_v33  ;;  %vm1933_vm2 = vcmask 498688  }
 0x3b9   :  { %702 = vst [vmem:[#allocation2 + $0x8] sm:$0xff] %v1714_v34 }
 0x3bb   :  { %v707_v35 = vpop.permute.xlu1 %706  ;;  %v1718_v36 = vld [vmem:[#allocation2] sm:$0xff] }
 0x3bc   :  { %715 = vst.msk [vmem:[#allocation2 + $0x10] sm:$0xff] %vm714_vm6, %v707_v35  ;;  %864 = vrot.lane.b32.xlu1 %v1718_v36, %s1407_s0  ;;  %846 = vrot.lane.b32.xlu0 %v1718_v36, %s1408_s11  ;;  %vm1940_vm6 = vmmov %vm1939_vm4 }
 0x3bf   :  { %v709_v38 = vpop.permute.xlu1 %708 }
 0x3c0   :  { %v710_v40 = vsel %vm92_vm5, %v707_v35, %v709_v38  ;;  %717 = vst.msk [vmem:[#allocation2 + $0x20] sm:$0xff] %vm92_vm5, %v709_v38  ;;  %826 = vrot.lane.b32.xlu1 %v1718_v36, %s1409_s12  ;;  %vm1934_vm5 = vmmov %vm1933_vm2 }
 0x3c1   :  { %716 = vst [vmem:[#allocation2 + $0x18] sm:$0xff] %v710_v40 }
 0x3c3   :  { %v860_v42 = vld [vmem:[#allocation2 + $0x10] sm:$0xff] }
 0x3c4   :  { %806 = vrot.lane.b32.xlu1 %v1718_v36, %s1410_s13 }
 0x3c7   :  { %v1034_v41 = vld [vmem:[#allocation2 + $0x20] sm:$0xff] }
 0x3c8   :  { %788 = vrot.lane.b32.xlu1 %v1718_v36, %s1411_s14  ;;  %1042 = vrot.lane.b32.xlu0 %v1034_v41, %s1413_s16 }
 0x3cc   :  { %768 = vrot.lane.b32.xlu1 %v1718_v36, %s1412_s15  ;;  %1024 = vrot.lane.b32.xlu0 %v1034_v41, %s1416_s19 }
 0x3d0   :  { %748 = vrot.lane.b32.xlu1 %v1718_v36, %s1414_s17  ;;  %1004 = vrot.lane.b32.xlu0 %v1034_v41, %s1417_s20 }
 0x3d4   :  { %730 = vrot.lane.b32.xlu1 %v1718_v36, %s1415_s18  ;;  %984 = vrot.lane.b32.xlu0 %v1034_v41, %s1418_s21 }
 0x3d8   :  { %966 = vrot.lane.b32.xlu0 %v1034_v41, %s1421_s24  ;;  %908 = vrot.lane.b32.xlu1 %v1034_v41, %s1420_s23 }
 0x3dc   :  { %946 = vrot.lane.b32.xlu0 %v1034_v41, %s1422_s25  ;;  %866 = vrot.lane.b32.xlu1 %v1714_v34, %s1407_s0 }
 0x3e0   :  { %926 = vrot.lane.b32.xlu0 %v1034_v41, %s1419_s22  ;;  %868 = vrot.lane.b32.xlu1 %v860_v42, %s1407_s0 }
 0x3e4   :  { %848 = vrot.lane.b32.xlu0 %v1714_v34, %s1408_s11  ;;  %850 = vrot.lane.b32.xlu1 %v860_v42, %s1408_s11 }
 0x3e8   :  { %830 = vrot.lane.b32.xlu0 %v860_v42, %s1409_s12  ;;  %828 = vrot.lane.b32.xlu1 %v1714_v34, %s1409_s12 }
 0x3ec   :  { %1038 = vrot.lane.b32.xlu0 %v860_v42, %s1413_s16  ;;  %1040 = vrot.lane.b32.xlu1 %v710_v40, %s1413_s16 }
 0x3f0   :  { %810 = vrot.lane.b32.xlu0 %v860_v42, %s1410_s13  ;;  %808 = vrot.lane.b32.xlu1 %v1714_v34, %s1410_s13 }
 0x3f4   :  { %1020 = vrot.lane.b32.xlu0 %v860_v42, %s1416_s19  ;;  %1022 = vrot.lane.b32.xlu1 %v710_v40, %s1416_s19 }
 0x3f8   :  { %792 = vrot.lane.b32.xlu0 %v860_v42, %s1411_s14  ;;  %790 = vrot.lane.b32.xlu1 %v1714_v34, %s1411_s14 }
 0x3fc   :  { %1000 = vrot.lane.b32.xlu0 %v860_v42, %s1417_s20  ;;  %1002 = vrot.lane.b32.xlu1 %v710_v40, %s1417_s20 }
 0x400   :  { %772 = vrot.lane.b32.xlu0 %v860_v42, %s1412_s15  ;;  %770 = vrot.lane.b32.xlu1 %v1714_v34, %s1412_s15 }
 0x404   :  { %980 = vrot.lane.b32.xlu0 %v860_v42, %s1418_s21  ;;  %982 = vrot.lane.b32.xlu1 %v710_v40, %s1418_s21 }
 0x408   :  { %752 = vrot.lane.b32.xlu0 %v860_v42, %s1414_s17  ;;  %750 = vrot.lane.b32.xlu1 %v1714_v34, %s1414_s17 }
 0x40c   :  { %962 = vrot.lane.b32.xlu0 %v860_v42, %s1421_s24  ;;  %964 = vrot.lane.b32.xlu1 %v710_v40, %s1421_s24 }
 0x410   :  { %734 = vrot.lane.b32.xlu0 %v860_v42, %s1415_s18  ;;  %732 = vrot.lane.b32.xlu1 %v1714_v34, %s1415_s18 }
 0x414   :  { %942 = vrot.lane.b32.xlu0 %v860_v42, %s1422_s25  ;;  %944 = vrot.lane.b32.xlu1 %v710_v40, %s1422_s25 }
 0x418   :  { %924 = vrot.lane.b32.xlu1 %v710_v40, %s1419_s22  ;;  %906 = vrot.lane.b32.xlu0 %v710_v40, %s1420_s23 }
 0x41c   :  { %922 = vrot.lane.b32.xlu1 %v860_v42, %s1419_s22  ;;  %904 = vrot.lane.b32.xlu0 %v860_v42, %s1420_s23 }
 0x420   :  { %888 = vrot.lane.b32.xlu0 %v1034_v41, %s1407_s0  ;;  %886 = vrot.lane.b32.xlu1 %v710_v40, %s1407_s0 }
 0x424   :  { %884 = vrot.lane.b32.xlu1 %v860_v42, %s1407_s0  ;;  %s1424_s0 = smov [#allocation4]  }
 0x425   :  { %s1290_s11 = sshll.u32 %s1424_s0, 4  ;;  %s1291_s11 = int_to_ptr.vmem [resolvable:$true] %s1290_s11 }
 0x426   :  { %p1387_p1 = scmp.lt.s32.totalorder %s1291_s11, %s1291_s11 }
 0x42e   :  { %v865_v43 = vpop.permute.xlu1 %864  ;;  %v847_v45 = vpop.permute.xlu0 %846 }
 0x432   :  { %v827_v44 = vpop.permute.xlu1 %826 }
 0x436   :  { %v807_v46 = vpop.permute.xlu1 %806 }
 0x43a   :  { %v1043_v47 = vpop.permute.xlu0 %1042  ;;  %v789_v48 = vpop.permute.xlu1 %788 }
 0x43e   :  { %v1025_v49 = vpop.permute.xlu0 %1024  ;;  %v769_v50 = vpop.permute.xlu1 %768 }
 0x442   :  { %v1005_v51 = vpop.permute.xlu0 %1004  ;;  %v1789_v52 = vpop.permute.xlu1 %748 }
 0x446   :  { %v1791_v53 = vpop.permute.xlu0 %984  ;;  %v1793_v54 = vpop.permute.xlu1 %730 }
 0x44a   :  { %v1795_v55 = vpop.permute.xlu0 %966  ;;  %v1797_v56 = vpop.permute.xlu1 %908 }
 0x44e   :  { %v1799_v57 = vpop.permute.xlu0 %946  ;;  %v867_v59 = vpop.permute.xlu1 %866 }
 0x44f   :  { %v870_v0 = vsel %vm269_vm7, %v865_v43, %v867_v59 }
 0x452   :  { %v1801_v61 = vpop.permute.xlu0 %926  ;;  %v869_v62 = vpop.permute.xlu1 %868 }
 0x453   :  { %v871_v63 = vsel %vm269_vm7, %v867_v59, %v869_v62 }
 0x454   :  { %1329 = vmatprep.subr.msk.mxu0 %vm1571_vm8, %v871_v63 }
 0x455   :  { %1330 = vmatpush1.msk.msra.mxu0 %vm1575_vm9, %v870_v0 }
 0x456   :  { %v849_v1 = vpop.permute.xlu0 %848  ;;  %v851_v2 = vpop.permute.xlu1 %850 }
 0x457   :  { %v852_v3 = vsel %vm250_vm10, %v847_v45, %v849_v1  ;;  %v853_v4 = vsel %vm250_vm10, %v849_v1, %v851_v2  ;;  %vm1935_vm10 = vcmask 908288  }
 0x458   :  { %1108 = vmatprep.subr.mxu0 %v853_v4 }
 0x459   :  { %1109 = vmatpush1.msra.mxu0 %v852_v3 }
 0x45a   :  { %v831_v5 = vpop.permute.xlu0 %830  ;;  %v829_v6 = vpop.permute.xlu1 %828 }
 0x45b   :  { %v832_v7 = vsel %vm229_vm11, %v827_v44, %v829_v6  ;;  %v833_v8 = vsel %vm229_vm11, %v829_v6, %v831_v5  ;;  %vm1936_vm11 = vmmov %vm1935_vm10 }
 0x45c   :  { %1331 = vmatprep.subr.msk.mxu0 %vm1596_vm12, %v833_v8 }
 0x45d   :  { %1332 = vmatpush1.msk.msra.mxu0 %vm1601_vm14, %v832_v7 }
 0x45e   :  { %v1039_v9 = vpop.permute.xlu0 %1038  ;;  %v1041_v10 = vpop.permute.xlu1 %1040 }
 0x45f   :  { %v1044_v11 = vsel %vm451_vm3, %v1039_v9, %v1041_v10  ;;  %v1045_v13 = vsel %vm451_vm3, %v1041_v10, %v1043_v47 }
 0x460   :  { %1341 = vmatprep.subr.msk.mxu1 %vm1571_vm8, %v1045_v13 }
 0x461   :  { %1342 = vmatpush1.msk.msra.mxu1 %vm1575_vm9, %v1044_v11 }
 0x462   :  { %v811_v15 = vpop.permute.xlu0 %810  ;;  %v809_v16 = vpop.permute.xlu1 %808 }
 0x463   :  { %v812_v17 = vsel %vm208_vm13, %v807_v46, %v809_v16  ;;  %v813_v18 = vsel %vm208_vm13, %v809_v16, %v811_v15  ;;  %vm1937_vm13 = vcmask 506880  }
 0x464   :  { %1333 = vmatprep.subr.msk.mxu0 %vm1571_vm8, %v813_v18  ;;  %vm1938_vm3 = vmmov %vm1937_vm13 }
 0x465   :  { %1334 = vmatpush1.msk.msra.mxu0 %vm1575_vm9, %v812_v17 }
 0x466   :  { %v1021_v19 = vpop.permute.xlu0 %1020  ;;  %v1023_v20 = vpop.permute.xlu1 %1022 }
 0x467   :  { %v1026_v21 = vsel %vm1933_vm2, %v1021_v19, %v1023_v20  ;;  %v1027_v22 = vsel %vm1934_vm5, %v1023_v20, %v1025_v49  ;;  %vm1941_vm2 = vcmask 621568  }
 0x468   :  { %1179 = vmatprep.subr.mxu1 %v1027_v22  ;;  %vm1942_vm5 = vmmov %vm1941_vm2 }
 0x469   :  { %1180 = vmatpush1.msra.mxu1 %v1026_v21 }
 0x46a   :  { %v793_v23 = vpop.permute.xlu0 %792  ;;  %v791_v24 = vpop.permute.xlu1 %790 }
 0x46b   :  { %v794_v25 = vsel %vm1935_vm10, %v789_v48, %v791_v24  ;;  %v795_v26 = vsel %vm1936_vm11, %v791_v24, %v793_v23  ;;  %vm1943_vm10 = vcmask 1031168  }
 0x46c   :  { %1114 = vmatprep.subr.mxu0 %v795_v26  ;;  %vm1944_vm11 = vmmov %vm1943_vm10  ;;  %v1252_v26 = vld [vmem:[%s1913_s5] sm:$0xff]  ;;  %s1382_s5 = scalar_lea.vmem %s1291_s11, 512 }
 0x46d   :  { %1115 = vmatpush1.msra.mxu0 %v794_v25  ;;  %p1383_p0 = scmp.ne.s32.totalorder %s1291_s11, %s1382_s5  ;;  %p1388_p2 = scmp.lt.s32.totalorder %s1382_s5, %s1382_s5 }
 0x46e   :  { %v1001_v27 = vpop.permute.xlu0 %1000  ;;  %v1003_v28 = vpop.permute.xlu1 %1002 }
 0x46f   :  { %v1006_v29 = vsel %vm1937_vm13, %v1001_v27, %v1003_v28  ;;  %v1007_v30 = vsel %vm1938_vm3, %v1003_v28, %v1005_v51  ;;  %vm1945_vm13 = vcmask 1039360   ;;  %p1389_p3 = por %p1388_p2, %p1387_p1 }
 0x470   :  { %1343 = vmatprep.subr.msk.mxu1 %vm1596_vm12, %v1007_v30  ;;  %vm1946_vm3 = vmmov %vm1945_vm13 }
 0x471   :  { %1344 = vmatpush1.msk.msra.mxu1 %vm1601_vm14, %v1006_v29  ;;  %v1256_v29 = vld [vmem:[%s1914_s6] sm:$0xff]  ;;  %p1390_p4 = pnand %p1389_p3, %p1383_p0 }
 0x472   :  { %v773_v14 = vpop.permute.xlu0 %772  ;;  %v771_v31 = vpop.permute.xlu1 %770 }
 0x473   :  { %v774_v12 = vsel %vm1939_vm4, %v769_v50, %v771_v31  ;;  %v775_v32 = vsel %vm1940_vm6, %v771_v31, %v773_v14  ;;  %vm1949_vm4 = vcmask 760832  }
 0x474   :  { %1335 = vmatprep.subr.msk.mxu0 %vm1596_vm12, %v775_v32  ;;  %vm1950_vm6 = vmmov %vm1949_vm4 }
 0x475   :  { %1336 = vmatpush1.msk.msra.mxu0 %vm1601_vm14, %v774_v12 }
 0x476   :  { %v981_v33 = vpop.permute.xlu0 %980  ;;  %v983_v35 = vpop.permute.xlu1 %982 }
 0x477   :  { %v986_v38 = vsel %vm1941_vm2, %v981_v33, %v983_v35  ;;  %v987_v40 = vsel %vm1942_vm5, %v983_v35, %v1791_v53  ;;  %v1052_v53 = vld [vmem:[%s1912_s4] sm:$0xff] }
 0x478   :  { %1345 = vmatprep.subr.msk.mxu1 %vm1571_vm8, %v987_v40 }
 0x479   :  { %1346 = vmatpush1.msk.msra.mxu1 %vm1575_vm9, %v986_v38 }
 0x47a   :  { %v753_v41 = vpop.permute.xlu0 %752  ;;  %v751_v42 = vpop.permute.xlu1 %750 }
 0x47b   :  { %v754_v43 = vsel %vm1943_vm10, %v1789_v52, %v751_v42  ;;  %v755_v44 = vsel %vm1944_vm11, %v751_v42, %v753_v41 }
 0x47c   :  { %1337 = vmatprep.subr.msk.mxu0 %vm1571_vm8, %v755_v44 }
 0x47d   :  { %1338 = vmatpush1.msk.msra.mxu0 %vm1575_vm9, %v754_v43 }
 0x47e   :  { %v963_v45 = vpop.permute.xlu0 %962  ;;  %v965_v46 = vpop.permute.xlu1 %964 }
 0x47f   :  { %v968_v47 = vsel %vm371_vm1, %v963_v45, %v965_v46  ;;  %v969_v48 = vsel %vm371_vm1, %v965_v46, %v1795_v55  ;;  %vm1947_vm1 = vcmask 752640  }
 0x480   :  { %1185 = vmatprep.subr.mxu1 %v969_v48 }
 0x481   :  { %1186 = vmatpush1.msra.mxu1 %v968_v47 }
 0x482   :  { %v735_v49 = vpop.permute.xlu0 %734  ;;  %v733_v50 = vpop.permute.xlu1 %732 }
 0x483   :  { %v736_v51 = vsel %vm1945_vm13, %v1793_v54, %v733_v50  ;;  %v737_v52 = vsel %vm1946_vm3, %v733_v50, %v735_v49 }
 0x484   :  { %1120 = vmatprep.subr.mxu0 %v737_v52 }
 0x485   :  { %1121 = vmatpush1.msra.mxu0 %v736_v51 }
 0x486   :  { %v943_v59 = vpop.permute.xlu0 %942  ;;  %1339 = vmatprep.subr.msk.mxu0 %vm1596_vm12, %v1714_v34  ;;  %v945_v55 = vpop.permute.xlu1 %944 }
 0x487   :  { %v948_v62 = vsel %vm350_vm15, %v943_v59, %v945_v55  ;;  %v949_v63 = vsel %vm350_vm15, %v945_v55, %v1799_v57  ;;  %1340 = vmatpush1.msk.msra.mxu0 %vm1601_vm14, %v1718_v36  ;;  %vm1948_vm15 = vmmov %vm1947_vm1 }
 0x488   :  { %1347 = vmatprep.subr.msk.mxu1 %vm1596_vm12, %v949_v63  ;;  %1303 = vmatmul.mubr.msk.f32.vlgmr.msra.gmra.mxu0 %vm497_vm0, %v1052_v53 }
 0x489   :  { %1348 = vmatpush1.msk.msra.mxu1 %vm1601_vm14, %v948_v62 }
 0x48a   :  { %v907_v54 = vpop.permute.xlu0 %906  ;;  %v925_v34 = vpop.permute.xlu1 %924 }
 0x48b   :  { %v929_v0 = vsel %vm1947_vm1, %v925_v34, %v1801_v61  ;;  %v911_v2 = vsel %vm1949_vm4, %v907_v54, %v1797_v56 }
 0x48c   :  { %1349 = vmatprep.subr.msk.mxu1 %vm1571_vm8, %v929_v0 }
 0x48e   :  { %v905_v57 = vpop.permute.xlu0 %904  ;;  %v923_v1 = vpop.permute.xlu1 %922 }
 0x48f   :  { %v928_v36 = vsel %vm1948_vm15, %v923_v1, %v925_v34  ;;  %v910_v3 = vsel %vm1950_vm6, %v905_v57, %v907_v54 }
 0x490   :  { %1350 = vmatpush1.msk.msra.mxu1 %vm1575_vm9, %v928_v36 }
 0x491   :  { %1191 = vmatprep.subr.mxu1 %v911_v2 }
 0x492   :  { %v889_v4 = vpop.permute.xlu0 %888  ;;  %1192 = vmatpush1.msra.mxu1 %v910_v3  ;;  %v887_v5 = vpop.permute.xlu1 %886 }
 0x493   :  { %v891_v61 = vsel %vm269_vm7, %v887_v5, %v889_v4 }
 0x494   :  { %1351 = vmatprep.subr.msk.mxu1 %vm1596_vm12, %v891_v61 }
 0x496   :  { %v885_v37 = vpop.permute.xlu1 %884 }
 0x497   :  { %v890_v6 = vsel %vm269_vm7, %v885_v37, %v887_v5 }
 0x498   :  { %1352 = vmatpush1.msk.msra.mxu1 %vm1601_vm14, %v890_v6 }
 0x499   :  { %1304 = vmatmul.mubr.msk.f32.vlgmr.msra.gmra.mxu1 %vm497_vm0, %v1052_v53 }
 0x548   :  { %v1158_v39 = vpop.f32.mrf.mxu0 }
 0x549   :  { %v1239_v7 = vmul.f32 %v1158_v39, %v1158_v39 }
 0x54a   :  { %v1160_v56 = vpop.f32.mrf.mxu0 }
 0x54b   :  { %v1240_v8 = vmul.f32 %v1160_v56, %v1160_v56  ;;  %v1234_v9 = vadd.f32 %v1160_v56, %v1158_v39 }
 0x54d   :  { %v1243_v11 = vadd.f32 %v1240_v8, %v1239_v7 }
 0x559   :  { %v1229_v10 = vpop.f32.mrf.mxu1 }
 0x55a   :  { %v1235_v13 = vadd.f32 %v1234_v9, %v1229_v10  ;;  %v1241_v15 = vmul.f32 %v1229_v10, %v1229_v10 }
 0x55b   :  { %v1231_v16 = vpop.f32.mrf.mxu1 }
 0x55c   :  { %v1244_v58 = vadd.f32 %v1243_v11, %v1241_v15  ;;  %v1236_v17 = vadd.f32 %v1235_v13, %v1231_v16  ;;  %v1242_v18 = vmul.f32 %v1231_v16, %v1231_v16 }
 0x55e   :  { %v1245_v19 = vadd.f32 %v1244_v58, %v1242_v18  ;;  %1237 = vadd.xlane.f32.xlu0 %v1236_v17 }
 0x560   :  { %1246 = vadd.xlane.f32.xlu1 %v1245_v19 }
 0x5e7   :  { %v1238_v60 = vpop.xlane.xlu0 %1237 }
 0x5e8   :  { %v1248_v20 = vmul.f32 0.001953125, %v1238_v60 }
 0x5e9   :  { %v1247_v21 = vpop.xlane.xlu1 %1246 }
 0x5ea   :  { %v1250_v22 = vmul.f32 %v1248_v20, %v1248_v20  ;;  %v1249_v23 = vmul.f32 0.001953125, %v1247_v21 }
 0x5ec   :  { %v1251_v24 = vsub.f32 %v1249_v23, %v1250_v22 }
 0x5ee   :  { %v1253_v25 = vadd.f32 1e-05, %v1251_v24 }
 0x5f0   :  { %1380 = vrsqrt.f32 %v1253_v25 }
 0x5fd   :  { %v1381_v27 = vpop.eup %1380 }
 0x5fe   :  { %v1255_v28 = vmul.f32 %v1381_v27, %v1252_v26 }
 0x600   :  { %1261 = vperm.xlu0 %1376, %v1255_v28   ;;  %v1257_v30 = vmul.f32 %v1255_v28, %v1248_v20 }
 0x602   :  { %v1258_v14 = vsub.f32 %v1256_v29, %v1257_v30 }
 0x604   :  { %1270 = vperm.xlu1 %1377, %v1258_v14  }
 0x67b   :  { %v1262_v31 = vpop.permute.xlu0 %1261 }
 0x67c   :  { %v1264_v12 = vmul.f32 %v1262_v31, %v1158_v39  ;;  %v1265_v32 = vmul.f32 %v1262_v31, %v1160_v56  ;;  %v1266_v33 = vmul.f32 %v1262_v31, %v1229_v10  ;;  %v1267_v35 = vmul.f32 %v1262_v31, %v1231_v16 }
 0x67f   :  { %v1271_v38 = vpop.permute.xlu1 %1270 }
 0x680   :  { %v1273_v40 = vadd.f32 %v1271_v38, %v1264_v12  ;;  %v1274_v41 = vadd.f32 %v1271_v38, %v1265_v32  ;;  %v1275_v42 = vadd.f32 %v1271_v38, %v1266_v33  ;;  %v1276_v43 = vadd.f32 %v1271_v38, %v1267_v35 }
 0x682   :  { %v1277_v44 = vmax.f32 %v1273_v40, 0.0  ;;  %v1278_v45 = vmax.f32 %v1274_v41, 0.0  ;;  %v1279_v46 = vmax.f32 %v1275_v42, 0.0  ;;  %v1280_v47 = vmax.f32 %v1276_v43, 0.0 }
 0x684   :  { %1281 = vst [vmem:[#allocation4] sm:$0xff] %v1277_v44  ;;  %1282 = vst [vmem:[#allocation4 + $0x8] sm:$0xff] %v1278_v45 }
 0x685   :  { %1283 = vst [vmem:[#allocation4 + $0x10] sm:$0xff] %v1279_v46  ;;  %1284 = vst [vmem:[#allocation4 + $0x18] sm:$0xff] %v1280_v47 }
 0x686   :  { %1393 = shalt.err (!%p1390_p4)
}
 0x687   :  { %s1425_s6 = smov 256   ;;  %s1426_s12 = smov 16  }
 0x688   :  { %1296 = dma.vmem_to_hbm [thread:$0]  %s1291_s11, 512, %s1915_s7, [#allocation5], %s1425_s6, %s1425_s6, %s1426_s12  }
 0x689   :  { %1402 = dma.done.wait [#allocation5], 512  }
 0x68a   :  { %1403 = vsyncadd [#allocation5], 4294966784 }
 0x68b   :  { %1300 = vsyncpa [#allocation5], 1 }

</bundles_post_ra>
